<compile_context>
chip_gen: v5e
topology: v5e:2x2
jax: 0.10.0
libtpu: 0.0.40
codegen_flags: <defaults>
</compile_context>

<pallas_src>
import functools

import jax
import jax.numpy as jnp
from jax.experimental import pallas as pl


# ----------------------------------------------------------------------------
# Fused MHSA kernel (one invocation, no grid)
# ----------------------------------------------------------------------------
def _mhsa_fused_kernel(x_ref, wqkv_ref, w0_ref, o_ref, *, B, T, H, D, scale):
    # x_ref:    (B*T, C)      tokens on sublanes, channels on lanes
    # wqkv_ref: (3*H*D, C)    rows pre-grouped as (k, h, d)  [done once at init]
    # w0_ref:   (O, H*D)      native PyTorch Linear (out, in) layout
    # o_ref:    (B, 1, T*O)   lane-dense output slab; row b == y[b].reshape(-1)
    C = x_ref.shape[-1]
    O = w0_ref.shape[0]
    HD = H * D
    G = B * H

    # Optional v6e/v7x refinement: cast matmul operands to bf16 (keep
    # preferred_element_type=f32 and all softmax math in f32).  Kept f32 here so the
    # same kernel is also optimal on v5e (no bf16 VPU/EUP there).
    x = x_ref[...].astype(jnp.float32)            # (B*T, C)
    wqkv = wqkv_ref[...].astype(jnp.float32)      # (3*HD, C)
    w0 = w0_ref[...].astype(jnp.float32)          # (O, HD)

    # ---- QKV projection: ONE (B*T, C) x (C, 3*H*D) MXU matmul (trans_b) --------
    qkv = jnp.einsum('nc,rc->nr', x, wqkv,
                     preferred_element_type=jnp.float32)        # (B*T, 3*HD)

    # ---- head split with layout-safe ops (lane slices + leading-dim stack) -----
    def split_heads(flat):                         # (B*T, H*D) -> (B*H, T, D)
        per_head = [flat[:, h * D:(h + 1) * D].reshape(B, T, D) for h in range(H)]
        return jnp.stack(per_head, axis=1).reshape(G, T, D)

    q = split_heads(qkv[:, 0 * HD:1 * HD])         # (G, T, D)
    k = split_heads(qkv[:, 1 * HD:2 * HD])
    v = split_heads(qkv[:, 2 * HD:3 * HD])

    # ---- scaled dot-product attention, batched over all (batch, head) pairs ----
    # (T and D are tiny here, so the whole (G, T, T) score tensor stays resident;
    #  a KV-tiled flash-style loop would be required before scaling T up.)
    s = jnp.einsum('gid,gjd->gij', q, k,
                   preferred_element_type=jnp.float32) * scale  # (G, T, T)
    # TODO(synk): mask=None path only; the masked_fill(-inf) branch is not implemented.
    s = s - jnp.max(s, axis=-1, keepdims=True)
    p = jnp.exp(s)
    p = p / jnp.sum(p, axis=-1, keepdims=True)                  # exact softmax
    ctx = jnp.einsum('gij,gjd->gid', p, v,
                     preferred_element_type=jnp.float32)        # (G, T, D)

    # ---- merge heads 'b h t d -> b t (h d)' via lane concatenation --------------
    ctx4 = ctx.reshape(B, H, T, D)
    ctx_flat = jnp.concatenate([ctx4[:, h] for h in range(H)], axis=-1)  # (B, T, HD)
    ctx_flat = ctx_flat.reshape(B * T, HD)                               # (B*T, HD)

    # ---- output projection: ONE (B*T, H*D) x (H*D, O) MXU matmul (trans_b) -----
    y = jnp.einsum('nc,oc->no', ctx_flat, w0,
                   preferred_element_type=jnp.float32)          # (B*T, O)
    y = y.reshape(B, T, O)

    # ---- lane-dense writeback: (B, T, O) -> (B, 1, T*O) ------------------------
    y_wide = jnp.concatenate([y[:, t:t + 1, :] for t in range(T)], axis=-1)
    o_ref[...] = y_wide.astype(o_ref.dtype)


# ----------------------------------------------------------------------------
# One-time (init-time) parameter re-layout — hoisted out of the forward path
# ----------------------------------------------------------------------------
def prepare_mhsa_weights(w_qkv, w_0, *, heads, dim_head):
    """
    w_qkv: (3*heads*dim_head, dim)  PyTorch Linear (out, in) layout of to_qvk
    w_0:   (dim, heads*dim_head)    PyTorch Linear (out, in) layout of W_0
    Returns (w_qkv_grouped, w_0): QKV rows re-grouped so the kernel's single matmul
    produces columns ordered (k, h, d); W_0 is used as-is.
    Original einops factoring 'b t (d k h)': row o = d*(3*H) + k*H + h
    Regrouped row r = k*(H*D) + h*D + d.
    """
    H, D = heads, dim_head
    C = w_qkv.shape[1]
    assert w_qkv.shape == (3 * H * D, C)
    w_qkv_g = jnp.transpose(w_qkv.reshape(D, 3, H, C), (1, 2, 0, 3)).reshape(3 * H * D, C)
    return w_qkv_g, w_0


# ----------------------------------------------------------------------------
# Module forward
# ----------------------------------------------------------------------------
def multi_head_self_attention(x, w_qkv_grouped, w_0, *, heads, dim_head):
    """
    x:             (B, T, dim)
    w_qkv_grouped: (3*heads*dim_head, dim)  -- from prepare_mhsa_weights
    w_0:           (dim, heads*dim_head)    -- native PyTorch layout
    """
    B, T, C = x.shape
    H, D = heads, dim_head
    HD = H * D
    O = w_0.shape[0]
    assert w_qkv_grouped.shape == (3 * HD, C)
    assert w_0.shape == (O, HD)
    scale = float(D) ** (-0.5)

    x_flat = x.reshape(B * T, C)   # free metadata reshape at the XLA level

    kernel = functools.partial(_mhsa_fused_kernel, B=B, T=T, H=H, D=D, scale=scale)
    # TODO(synk): for batches much larger than this toy size, expose grid=(B,) with
    # pltpu.CompilerParams(dimension_semantics=("parallel",)) so both v7x TensorCores
    # are used; grid-less is optimal for the single-tile problem here.
    out = pl.pallas_call(
        kernel,
        out_shape=jax.ShapeDtypeStruct((B, 1, T * O), x.dtype),
        in_specs=[
            pl.BlockSpec((B * T, C), lambda: (0, 0)),
            pl.BlockSpec((3 * HD, C), lambda: (0, 0)),
            pl.BlockSpec((O, HD), lambda: (0, 0)),
        ],
        out_specs=pl.BlockSpec((B, 1, T * O), lambda: (0, 0, 0)),
    )(x_flat, w_qkv_grouped, w_0)
    return out.reshape(B, T, O)


# ----------------------------------------------------------------------------
# Pure-JAX reference (mirrors the PyTorch module exactly; takes ORIGINAL weights)
# ----------------------------------------------------------------------------
def reference_mhsa(x, w_qkv, w_0, *, heads, dim_head):
    B, T, dim = x.shape
    _dim = heads * dim_head
    scale = float(dim_head) ** (-0.5)
    qkv = jnp.einsum("btc,oc->bto", x, w_qkv)
    qkv = qkv.reshape(B, T, dim_head, 3, heads)            # 'b t (d k h)'
    qkv = jnp.transpose(qkv, (3, 0, 4, 1, 2))              # (3, B, H, T, D)
    q, k, v = qkv[0], qkv[1], qkv[2]
    s = jnp.einsum("bhid,bhjd->bhij", q, k) * scale
    p = jax.nn.softmax(s, axis=-1)
    out = jnp.einsum("bhij,bhjd->bhid", p, v)
    out = jnp.transpose(out, (0, 2, 1, 3)).reshape(B, T, _dim)
    return jnp.einsum("bto,do->btd", out, w_0)


if __name__ == "__main__":
    # Small shapes consistent with the module: dim=32, heads=8 -> dim_head=4.
    B, T, DIM, HEADS = 2, 8, 32, 8
    DIM_HEAD = DIM // HEADS
    _DIM = DIM_HEAD * HEADS

    key = jax.random.PRNGKey(0)
    kx, kqkv, kw0 = jax.random.split(key, 3)

    x = jax.random.normal(kx, (B, T, DIM), dtype=jnp.float32)
    # PyTorch Linear layout: (out_features, in_features); bias=False in the module.
    w_qkv = jax.random.normal(kqkv, (3 * _DIM, DIM), dtype=jnp.float32) * (DIM ** -0.5)
    w_0 = jax.random.normal(kw0, (DIM, _DIM), dtype=jnp.float32) * (_DIM ** -0.5)

    # Init-time weight re-grouping (hoisted out of the hot path).
    w_qkv_g, w_0_g = prepare_mhsa_weights(w_qkv, w_0, heads=HEADS, dim_head=DIM_HEAD)

    fwd = jax.jit(functools.partial(multi_head_self_attention,
                                    heads=HEADS, dim_head=DIM_HEAD))
    y = jax.block_until_ready(fwd(x, w_qkv_g, w_0_g))

    y_ref = reference_mhsa(x, w_qkv, w_0, heads=HEADS, dim_head=DIM_HEAD)
    assert y.shape == (B, T, DIM)
    assert jnp.allclose(y, y_ref, atol=1e-3, rtol=1e-3), "mismatch vs reference"

    print("KERNEL_OK")
</pallas_src>

<mosaic_0001>
module attributes {stable_mosaic.version = 11 : i64} {
  func.func @_mhsa_fused_kernel(%arg0: memref<16x32xf32, #tpu.memory_space<vmem>>, %arg1: memref<96x32xf32, #tpu.memory_space<vmem>>, %arg2: memref<32x32xf32, #tpu.memory_space<vmem>>, %arg3: memref<2x1x256xf32, #tpu.memory_space<vmem>>) attributes {dimension_semantics = [], scalar_prefetch = 0 : i64, scratch_operands = 0 : i64, tpu.core_type = #tpu.core_type<tc>} {
    %c0 = arith.constant 0 : index
    %c0_0 = arith.constant 0 : index
    %0 = vector.load %arg0[%c0, %c0_0] : memref<16x32xf32, #tpu.memory_space<vmem>>, vector<16x32xf32>
    %c0_1 = arith.constant 0 : index
    %c0_2 = arith.constant 0 : index
    %1 = vector.load %arg1[%c0_1, %c0_2] : memref<96x32xf32, #tpu.memory_space<vmem>>, vector<96x32xf32>
    %c0_3 = arith.constant 0 : index
    %c0_4 = arith.constant 0 : index
    %2 = vector.load %arg2[%c0_3, %c0_4] : memref<32x32xf32, #tpu.memory_space<vmem>>, vector<32x32xf32>
    "tpu.trace_start"() <{level = 10 : i32, message = "nc,rc->nr"}> : () -> ()
    %cst = arith.constant dense<0.000000e+00> : vector<16x96xf32>
    %3 = tpu.matmul %0, %1, %cst {dimension_numbers = #tpu.dot_dimension_numbers<[1], [1], [0], [0], [0, 0, 1, 0], [], []>} : vector<16x32xf32>, vector<96x32xf32>, vector<16x96xf32> -> vector<16x96xf32>
    "tpu.trace_stop"() : () -> ()
    %4 = vector.extract_strided_slice %3 {offsets = [0, 0], sizes = [16, 32], strides = [1, 1]} : vector<16x96xf32> to vector<16x32xf32>
    %5 = vector.extract_strided_slice %4 {offsets = [0, 0], sizes = [16, 4], strides = [1, 1]} : vector<16x32xf32> to vector<16x4xf32>
    %6 = vector.shape_cast %5 : vector<16x4xf32> to vector<2x8x4xf32>
    %7 = vector.extract_strided_slice %4 {offsets = [0, 4], sizes = [16, 4], strides = [1, 1]} : vector<16x32xf32> to vector<16x4xf32>
    %8 = vector.shape_cast %7 : vector<16x4xf32> to vector<2x8x4xf32>
    %9 = vector.extract_strided_slice %4 {offsets = [0, 8], sizes = [16, 4], strides = [1, 1]} : vector<16x32xf32> to vector<16x4xf32>
    %10 = vector.shape_cast %9 : vector<16x4xf32> to vector<2x8x4xf32>
    %11 = vector.extract_strided_slice %4 {offsets = [0, 12], sizes = [16, 4], strides = [1, 1]} : vector<16x32xf32> to vector<16x4xf32>
    %12 = vector.shape_cast %11 : vector<16x4xf32> to vector<2x8x4xf32>
    %13 = vector.extract_strided_slice %4 {offsets = [0, 16], sizes = [16, 4], strides = [1, 1]} : vector<16x32xf32> to vector<16x4xf32>
    %14 = vector.shape_cast %13 : vector<16x4xf32> to vector<2x8x4xf32>
    %15 = vector.extract_strided_slice %4 {offsets = [0, 20], sizes = [16, 4], strides = [1, 1]} : vector<16x32xf32> to vector<16x4xf32>
    %16 = vector.shape_cast %15 : vector<16x4xf32> to vector<2x8x4xf32>
    %17 = vector.extract_strided_slice %4 {offsets = [0, 24], sizes = [16, 4], strides = [1, 1]} : vector<16x32xf32> to vector<16x4xf32>
    %18 = vector.shape_cast %17 : vector<16x4xf32> to vector<2x8x4xf32>
    %19 = vector.extract_strided_slice %4 {offsets = [0, 28], sizes = [16, 4], strides = [1, 1]} : vector<16x32xf32> to vector<16x4xf32>
    %20 = vector.shape_cast %19 : vector<16x4xf32> to vector<2x8x4xf32>
    %21 = vector.shape_cast %6 : vector<2x8x4xf32> to vector<2x1x8x4xf32>
    %22 = vector.shape_cast %8 : vector<2x8x4xf32> to vector<2x1x8x4xf32>
    %23 = vector.shape_cast %10 : vector<2x8x4xf32> to vector<2x1x8x4xf32>
    %24 = vector.shape_cast %12 : vector<2x8x4xf32> to vector<2x1x8x4xf32>
    %25 = vector.shape_cast %14 : vector<2x8x4xf32> to vector<2x1x8x4xf32>
    %26 = vector.shape_cast %16 : vector<2x8x4xf32> to vector<2x1x8x4xf32>
    %27 = vector.shape_cast %18 : vector<2x8x4xf32> to vector<2x1x8x4xf32>
    %28 = vector.shape_cast %20 : vector<2x8x4xf32> to vector<2x1x8x4xf32>
    %29 = tpu.concatenate %21, %22, %23, %24, %25, %26, %27, %28 in 1 : vector<2x1x8x4xf32>, vector<2x1x8x4xf32>, vector<2x1x8x4xf32>, vector<2x1x8x4xf32>, vector<2x1x8x4xf32>, vector<2x1x8x4xf32>, vector<2x1x8x4xf32>, vector<2x1x8x4xf32> -> vector<2x8x8x4xf32>
    %30 = vector.shape_cast %29 : vector<2x8x8x4xf32> to vector<16x8x4xf32>
    %31 = vector.extract_strided_slice %3 {offsets = [0, 32], sizes = [16, 32], strides = [1, 1]} : vector<16x96xf32> to vector<16x32xf32>
    %32 = vector.extract_strided_slice %31 {offsets = [0, 0], sizes = [16, 4], strides = [1, 1]} : vector<16x32xf32> to vector<16x4xf32>
    %33 = vector.shape_cast %32 : vector<16x4xf32> to vector<2x8x4xf32>
    %34 = vector.extract_strided_slice %31 {offsets = [0, 4], sizes = [16, 4], strides = [1, 1]} : vector<16x32xf32> to vector<16x4xf32>
    %35 = vector.shape_cast %34 : vector<16x4xf32> to vector<2x8x4xf32>
    %36 = vector.extract_strided_slice %31 {offsets = [0, 8], sizes = [16, 4], strides = [1, 1]} : vector<16x32xf32> to vector<16x4xf32>
    %37 = vector.shape_cast %36 : vector<16x4xf32> to vector<2x8x4xf32>
    %38 = vector.extract_strided_slice %31 {offsets = [0, 12], sizes = [16, 4], strides = [1, 1]} : vector<16x32xf32> to vector<16x4xf32>
    %39 = vector.shape_cast %38 : vector<16x4xf32> to vector<2x8x4xf32>
    %40 = vector.extract_strided_slice %31 {offsets = [0, 16], sizes = [16, 4], strides = [1, 1]} : vector<16x32xf32> to vector<16x4xf32>
    %41 = vector.shape_cast %40 : vector<16x4xf32> to vector<2x8x4xf32>
    %42 = vector.extract_strided_slice %31 {offsets = [0, 20], sizes = [16, 4], strides = [1, 1]} : vector<16x32xf32> to vector<16x4xf32>
    %43 = vector.shape_cast %42 : vector<16x4xf32> to vector<2x8x4xf32>
    %44 = vector.extract_strided_slice %31 {offsets = [0, 24], sizes = [16, 4], strides = [1, 1]} : vector<16x32xf32> to vector<16x4xf32>
    %45 = vector.shape_cast %44 : vector<16x4xf32> to vector<2x8x4xf32>
    %46 = vector.extract_strided_slice %31 {offsets = [0, 28], sizes = [16, 4], strides = [1, 1]} : vector<16x32xf32> to vector<16x4xf32>
    %47 = vector.shape_cast %46 : vector<16x4xf32> to vector<2x8x4xf32>
    %48 = vector.shape_cast %33 : vector<2x8x4xf32> to vector<2x1x8x4xf32>
    %49 = vector.shape_cast %35 : vector<2x8x4xf32> to vector<2x1x8x4xf32>
    %50 = vector.shape_cast %37 : vector<2x8x4xf32> to vector<2x1x8x4xf32>
    %51 = vector.shape_cast %39 : vector<2x8x4xf32> to vector<2x1x8x4xf32>
    %52 = vector.shape_cast %41 : vector<2x8x4xf32> to vector<2x1x8x4xf32>
    %53 = vector.shape_cast %43 : vector<2x8x4xf32> to vector<2x1x8x4xf32>
    %54 = vector.shape_cast %45 : vector<2x8x4xf32> to vector<2x1x8x4xf32>
    %55 = vector.shape_cast %47 : vector<2x8x4xf32> to vector<2x1x8x4xf32>
    %56 = tpu.concatenate %48, %49, %50, %51, %52, %53, %54, %55 in 1 : vector<2x1x8x4xf32>, vector<2x1x8x4xf32>, vector<2x1x8x4xf32>, vector<2x1x8x4xf32>, vector<2x1x8x4xf32>, vector<2x1x8x4xf32>, vector<2x1x8x4xf32>, vector<2x1x8x4xf32> -> vector<2x8x8x4xf32>
    %57 = vector.shape_cast %56 : vector<2x8x8x4xf32> to vector<16x8x4xf32>
    %58 = vector.extract_strided_slice %3 {offsets = [0, 64], sizes = [16, 32], strides = [1, 1]} : vector<16x96xf32> to vector<16x32xf32>
    %59 = vector.extract_strided_slice %58 {offsets = [0, 0], sizes = [16, 4], strides = [1, 1]} : vector<16x32xf32> to vector<16x4xf32>
    %60 = vector.shape_cast %59 : vector<16x4xf32> to vector<2x8x4xf32>
    %61 = vector.extract_strided_slice %58 {offsets = [0, 4], sizes = [16, 4], strides = [1, 1]} : vector<16x32xf32> to vector<16x4xf32>
    %62 = vector.shape_cast %61 : vector<16x4xf32> to vector<2x8x4xf32>
    %63 = vector.extract_strided_slice %58 {offsets = [0, 8], sizes = [16, 4], strides = [1, 1]} : vector<16x32xf32> to vector<16x4xf32>
    %64 = vector.shape_cast %63 : vector<16x4xf32> to vector<2x8x4xf32>
    %65 = vector.extract_strided_slice %58 {offsets = [0, 12], sizes = [16, 4], strides = [1, 1]} : vector<16x32xf32> to vector<16x4xf32>
    %66 = vector.shape_cast %65 : vector<16x4xf32> to vector<2x8x4xf32>
    %67 = vector.extract_strided_slice %58 {offsets = [0, 16], sizes = [16, 4], strides = [1, 1]} : vector<16x32xf32> to vector<16x4xf32>
    %68 = vector.shape_cast %67 : vector<16x4xf32> to vector<2x8x4xf32>
    %69 = vector.extract_strided_slice %58 {offsets = [0, 20], sizes = [16, 4], strides = [1, 1]} : vector<16x32xf32> to vector<16x4xf32>
    %70 = vector.shape_cast %69 : vector<16x4xf32> to vector<2x8x4xf32>
    %71 = vector.extract_strided_slice %58 {offsets = [0, 24], sizes = [16, 4], strides = [1, 1]} : vector<16x32xf32> to vector<16x4xf32>
    %72 = vector.shape_cast %71 : vector<16x4xf32> to vector<2x8x4xf32>
    %73 = vector.extract_strided_slice %58 {offsets = [0, 28], sizes = [16, 4], strides = [1, 1]} : vector<16x32xf32> to vector<16x4xf32>
    %74 = vector.shape_cast %73 : vector<16x4xf32> to vector<2x8x4xf32>
    %75 = vector.shape_cast %60 : vector<2x8x4xf32> to vector<2x1x8x4xf32>
    %76 = vector.shape_cast %62 : vector<2x8x4xf32> to vector<2x1x8x4xf32>
    %77 = vector.shape_cast %64 : vector<2x8x4xf32> to vector<2x1x8x4xf32>
    %78 = vector.shape_cast %66 : vector<2x8x4xf32> to vector<2x1x8x4xf32>
    %79 = vector.shape_cast %68 : vector<2x8x4xf32> to vector<2x1x8x4xf32>
    %80 = vector.shape_cast %70 : vector<2x8x4xf32> to vector<2x1x8x4xf32>
    %81 = vector.shape_cast %72 : vector<2x8x4xf32> to vector<2x1x8x4xf32>
    %82 = vector.shape_cast %74 : vector<2x8x4xf32> to vector<2x1x8x4xf32>
    %83 = tpu.concatenate %75, %76, %77, %78, %79, %80, %81, %82 in 1 : vector<2x1x8x4xf32>, vector<2x1x8x4xf32>, vector<2x1x8x4xf32>, vector<2x1x8x4xf32>, vector<2x1x8x4xf32>, vector<2x1x8x4xf32>, vector<2x1x8x4xf32>, vector<2x1x8x4xf32> -> vector<2x8x8x4xf32>
    %84 = vector.shape_cast %83 : vector<2x8x8x4xf32> to vector<16x8x4xf32>
    "tpu.trace_start"() <{level = 10 : i32, message = "gid,gjd->gij"}> : () -> ()
    %cst_5 = arith.constant dense<0.000000e+00> : vector<16x8x8xf32>
    %85 = tpu.matmul %30, %57, %cst_5 {dimension_numbers = #tpu.dot_dimension_numbers<[2], [2], [1], [1], [0, 0, 0, 1, 1, 1], [0], [0]>} : vector<16x8x4xf32>, vector<16x8x4xf32>, vector<16x8x8xf32> -> vector<16x8x8xf32>
    "tpu.trace_stop"() : () -> ()
    %cst_6 = arith.constant 5.000000e-01 : f32
    %86 = vector.broadcast %cst_6 : f32 to vector<16x8x8xf32>
    %87 = arith.mulf %85, %86 : vector<16x8x8xf32>
    %cst_7 = arith.constant dense<0xFF800000> : vector<16x8xf32>
    %88 = vector.multi_reduction <maximumf>, %87, %cst_7 [2] : vector<16x8x8xf32> to vector<16x8xf32>
    %89 = vector.shape_cast %88 : vector<16x8xf32> to vector<16x8x1xf32>
    %90 = vector.broadcast %89 : vector<16x8x1xf32> to vector<16x8x8xf32>
    %91 = arith.subf %87, %90 : vector<16x8x8xf32>
    %92 = math.exp %91 : vector<16x8x8xf32>
    %cst_8 = arith.constant dense<0.000000e+00> : vector<16x8xf32>
    %93 = vector.multi_reduction <add>, %92, %cst_8 [2] : vector<16x8x8xf32> to vector<16x8xf32>
    %94 = vector.shape_cast %93 : vector<16x8xf32> to vector<16x8x1xf32>
    %95 = vector.broadcast %94 : vector<16x8x1xf32> to vector<16x8x8xf32>
    %96 = arith.divf %92, %95 : vector<16x8x8xf32>
    "tpu.trace_start"() <{level = 10 : i32, message = "gij,gjd->gid"}> : () -> ()
    %cst_9 = arith.constant dense<0.000000e+00> : vector<16x8x4xf32>
    %97 = tpu.matmul %96, %84, %cst_9 {dimension_numbers = #tpu.dot_dimension_numbers<[2], [1], [1], [2], [0, 0, 0, 1, 1, 2], [0], [0]>} : vector<16x8x8xf32>, vector<16x8x4xf32>, vector<16x8x4xf32> -> vector<16x8x4xf32>
    "tpu.trace_stop"() : () -> ()
    %98 = vector.shape_cast %97 : vector<16x8x4xf32> to vector<2x8x8x4xf32>
    %99 = vector.extract_strided_slice %98 {offsets = [0, 0, 0, 0], sizes = [2, 1, 8, 4], strides = [1, 1, 1, 1]} : vector<2x8x8x4xf32> to vector<2x1x8x4xf32>
    %100 = vector.shape_cast %99 : vector<2x1x8x4xf32> to vector<2x8x4xf32>
    %101 = vector.extract_strided_slice %98 {offsets = [0, 1, 0, 0], sizes = [2, 1, 8, 4], strides = [1, 1, 1, 1]} : vector<2x8x8x4xf32> to vector<2x1x8x4xf32>
    %102 = vector.shape_cast %101 : vector<2x1x8x4xf32> to vector<2x8x4xf32>
    %103 = vector.extract_strided_slice %98 {offsets = [0, 2, 0, 0], sizes = [2, 1, 8, 4], strides = [1, 1, 1, 1]} : vector<2x8x8x4xf32> to vector<2x1x8x4xf32>
    %104 = vector.shape_cast %103 : vector<2x1x8x4xf32> to vector<2x8x4xf32>
    %105 = vector.extract_strided_slice %98 {offsets = [0, 3, 0, 0], sizes = [2, 1, 8, 4], strides = [1, 1, 1, 1]} : vector<2x8x8x4xf32> to vector<2x1x8x4xf32>
    %106 = vector.shape_cast %105 : vector<2x1x8x4xf32> to vector<2x8x4xf32>
    %107 = vector.extract_strided_slice %98 {offsets = [0, 4, 0, 0], sizes = [2, 1, 8, 4], strides = [1, 1, 1, 1]} : vector<2x8x8x4xf32> to vector<2x1x8x4xf32>
    %108 = vector.shape_cast %107 : vector<2x1x8x4xf32> to vector<2x8x4xf32>
    %109 = vector.extract_strided_slice %98 {offsets = [0, 5, 0, 0], sizes = [2, 1, 8, 4], strides = [1, 1, 1, 1]} : vector<2x8x8x4xf32> to vector<2x1x8x4xf32>
    %110 = vector.shape_cast %109 : vector<2x1x8x4xf32> to vector<2x8x4xf32>
    %111 = vector.extract_strided_slice %98 {offsets = [0, 6, 0, 0], sizes = [2, 1, 8, 4], strides = [1, 1, 1, 1]} : vector<2x8x8x4xf32> to vector<2x1x8x4xf32>
    %112 = vector.shape_cast %111 : vector<2x1x8x4xf32> to vector<2x8x4xf32>
    %113 = vector.extract_strided_slice %98 {offsets = [0, 7, 0, 0], sizes = [2, 1, 8, 4], strides = [1, 1, 1, 1]} : vector<2x8x8x4xf32> to vector<2x1x8x4xf32>
    %114 = vector.shape_cast %113 : vector<2x1x8x4xf32> to vector<2x8x4xf32>
    %115 = tpu.concatenate %100, %102, %104, %106, %108, %110, %112, %114 in 2 : vector<2x8x4xf32>, vector<2x8x4xf32>, vector<2x8x4xf32>, vector<2x8x4xf32>, vector<2x8x4xf32>, vector<2x8x4xf32>, vector<2x8x4xf32>, vector<2x8x4xf32> -> vector<2x8x32xf32>
    %116 = vector.shape_cast %115 : vector<2x8x32xf32> to vector<16x32xf32>
    "tpu.trace_start"() <{level = 10 : i32, message = "nc,oc->no"}> : () -> ()
    %cst_10 = arith.constant dense<0.000000e+00> : vector<16x32xf32>
    %117 = tpu.matmul %116, %2, %cst_10 {dimension_numbers = #tpu.dot_dimension_numbers<[1], [1], [0], [0], [0, 0, 1, 0], [], []>} : vector<16x32xf32>, vector<32x32xf32>, vector<16x32xf32> -> vector<16x32xf32>
    "tpu.trace_stop"() : () -> ()
    %118 = vector.shape_cast %117 : vector<16x32xf32> to vector<2x8x32xf32>
    %119 = vector.extract_strided_slice %118 {offsets = [0, 0, 0], sizes = [2, 1, 32], strides = [1, 1, 1]} : vector<2x8x32xf32> to vector<2x1x32xf32>
    %120 = vector.extract_strided_slice %118 {offsets = [0, 1, 0], sizes = [2, 1, 32], strides = [1, 1, 1]} : vector<2x8x32xf32> to vector<2x1x32xf32>
    %121 = vector.extract_strided_slice %118 {offsets = [0, 2, 0], sizes = [2, 1, 32], strides = [1, 1, 1]} : vector<2x8x32xf32> to vector<2x1x32xf32>
    %122 = vector.extract_strided_slice %118 {offsets = [0, 3, 0], sizes = [2, 1, 32], strides = [1, 1, 1]} : vector<2x8x32xf32> to vector<2x1x32xf32>
    %123 = vector.extract_strided_slice %118 {offsets = [0, 4, 0], sizes = [2, 1, 32], strides = [1, 1, 1]} : vector<2x8x32xf32> to vector<2x1x32xf32>
    %124 = vector.extract_strided_slice %118 {offsets = [0, 5, 0], sizes = [2, 1, 32], strides = [1, 1, 1]} : vector<2x8x32xf32> to vector<2x1x32xf32>
    %125 = vector.extract_strided_slice %118 {offsets = [0, 6, 0], sizes = [2, 1, 32], strides = [1, 1, 1]} : vector<2x8x32xf32> to vector<2x1x32xf32>
    %126 = vector.extract_strided_slice %118 {offsets = [0, 7, 0], sizes = [2, 1, 32], strides = [1, 1, 1]} : vector<2x8x32xf32> to vector<2x1x32xf32>
    %127 = tpu.concatenate %119, %120, %121, %122, %123, %124, %125, %126 in 2 : vector<2x1x32xf32>, vector<2x1x32xf32>, vector<2x1x32xf32>, vector<2x1x32xf32>, vector<2x1x32xf32>, vector<2x1x32xf32>, vector<2x1x32xf32>, vector<2x1x32xf32> -> vector<2x1x256xf32>
    %c0_11 = arith.constant 0 : index
    %c0_12 = arith.constant 0 : index
    %c0_13 = arith.constant 0 : index
    %128 = vector.load %arg3[%c0_11, %c0_12, %c0_13] : memref<2x1x256xf32, #tpu.memory_space<vmem>>, vector<2x1x256xf32>
    tpu.vector_store %arg3[%c0_11, %c0_12, %c0_13], %127 {strides = array<i32>} : memref<2x1x256xf32, #tpu.memory_space<vmem>>, vector<2x1x256xf32>,
    return
  }
}

</mosaic_0001>

<bundles_post_ra>
// kernel: multi_head_self_attention.1
= control target key start
LH: loop header
LB: loop body
LE: loop exit
PB: predicated region body
PF: predicated region fallthrough
CT: control target
= control target key end

     0   :  { %vm32_vm0 = vcmask 261120   ;;  %s1751_s13 = smov 108   ;;  %s1752_s14 = smov 112   ;;  %vm130_vm1 = vcmask 31744   ;;  %vm561_vm2 = vcmask 64512   ;;  %s2390_s1 = inlined_call_operand.vmem [shape: f32[96,32], index: 1, kind: input, shape index: {}]   ;;  %s2391_s0 = inlined_call_operand.vmem [shape: f32[16,32], index: 0, kind: input, shape index: {}]   ;;  %s2392_s2 = inlined_call_operand.vmem [shape: f32[32,32], index: 2, kind: input, shape index: {}]   ;;  %s2393_s3 = inlined_call_operand.vmem [shape: f32[2,1,256], index: 3, kind: output, shape index: {}]  }
   0x1   :  { %v27_v0 = vld [vmem:[%s2390_s1 + $0x58] sm:$0xff]  ;;  %v26_v1 = vld [vmem:[%s2390_s1 + $0x50] sm:$0xff]  ;;  %v25_v2 = vld [vmem:[%s2390_s1 + $0x48] sm:$0xff]  ;;  %s1754_s15 = smov 100   ;;  %s1755_s16 = smov 116  }
   0x2   :  { %1567 = vmatpush.xpose.msk.msra.mxu0 %vm32_vm0, %v27_v0  ;;  %v24_v3 = vld [vmem:[%s2390_s1 + $0x40] sm:$0xff]  ;;  %v23_v4 = vld [vmem:[%s2390_s1 + $0x38] sm:$0xff]  ;;  %v22_v5 = vld [vmem:[%s2390_s1 + $0x30] sm:$0xff]  ;;  %s1756_s17 = smov 120   ;;  %s1758_s18 = smov 96  }
   0x3   :  { %v21_v6 = vld [vmem:[%s2390_s1 + $0x28] sm:$0xff]  ;;  %v20_v7 = vld [vmem:[%s2390_s1 + $0x20] sm:$0xff]  ;;  %v19_v8 = vld [vmem:[%s2390_s1 + $0x18] sm:$0xff]  ;;  %s1759_s19 = smov 64   ;;  %s1760_s20 = smov 12  }
   0x4   :  { %v18_v9 = vld [vmem:[%s2390_s1 + $0x10] sm:$0xff]  ;;  %v17_v10 = vld [vmem:[%s2390_s1 + $0x8] sm:$0xff]  ;;  %v16_v11 = vld [vmem:[%s2390_s1] sm:$0xff]  ;;  %s1753_s1 = smov 124   ;;  %s1761_s21 = smov 8  }
   0x5   :  { %v14_v12 = vld [vmem:[%s2391_s0] sm:$0xff]  ;;  %v15_v13 = vld [vmem:[%s2391_s0 + $0x8] sm:$0xff]  ;;  %s1757_s0 = smov 104   ;;  %s1762_s22 = smov 4  }
   0x6   :  { %1568 = vmatpush.xpose.msk.msra.mxu0 %vm32_vm0, %v26_v1  ;;  %s1763_s23 = smov 24   ;;  %s1764_s24 = smov 20  }
   0x7   :  { %s1765_s25 = smov 16   ;;  %s1766_s26 = smov 28  }
   0xa   :  { %1569 = vmatpush.xpose.msk.msra.mxu0 %vm32_vm0, %v25_v2 }
   0xe   :  { %1570 = vmatpush.xpose.msk.msra.mxu0 %vm32_vm0, %v24_v3 }
  0x12   :  { %1571 = vmatpush.xpose.msk.msra.mxu0 %vm32_vm0, %v23_v4 }
  0x16   :  { %1572 = vmatpush.xpose.msk.msra.mxu0 %vm32_vm0, %v22_v5 }
  0x1a   :  { %1573 = vmatpush.xpose.msk.msra.mxu0 %vm32_vm0, %v21_v6 }
  0x1e   :  { %1574 = vmatpush.xpose.msk.msra.mxu0 %vm32_vm0, %v20_v7 }
  0x22   :  { %1575 = vmatpush.xpose.msk.msra.mxu0 %vm32_vm0, %v19_v8 }
  0x26   :  { %1576 = vmatpush.xpose.msk.msra.mxu0 %vm32_vm0, %v18_v9 }
  0x2a   :  { %1577 = vmatpush.xpose.msk.msra.mxu0 %vm32_vm0, %v17_v10 }
  0x2e   :  { %1578 = vmatpush.xpose.msk.msra.mxu0 %vm32_vm0, %v16_v11 }
  0x31   :  { %1579 = vmatmul.msk.f32.vlgmr.msra.gmra.mxu0 %vm32_vm0, %v14_v12 }
  0x39   :  { %1580 = vmatmul.msk.f32.gmra.mxu0 %vm32_vm0, %v15_v13 }
  0xae   :  { %v92_v14 = vpop.f32.mrf.mxu0 }
  0xaf   :  { %116 = vrot.lane.b32.xlu2 %v92_v14, %s1751_s13  ;;  %112 = vrot.lane.b32.xlu1 %v92_v14, %s1752_s14 }
  0xb0   :  { %100 = vrot.lane.b32.xlu0 %v92_v14, %s1753_s1 }
  0xb6   :  { %v1844_v15 = vpop.f32.mrf.mxu0 }
  0xb7   :  { %124 = vrot.lane.b32.xlu2 %v92_v14, %s1754_s15  ;;  %108 = vrot.lane.b32.xlu1 %v92_v14, %s1755_s16 }
  0xb8   :  { %104 = vrot.lane.b32.xlu0 %v92_v14, %s1756_s17 }
  0xbf   :  { %102 = vrot.lane.b32.xlu2 %v1844_v15, %s1753_s1  ;;  %106 = vrot.lane.b32.xlu1 %v1844_v15, %s1756_s17 }
  0xc0   :  { %120 = vrot.lane.b32.xlu0 %v92_v14, %s1757_s0 }
  0xc7   :  { %128 = vrot.lane.b32.xlu2 %v92_v14, %s1758_s18  ;;  %114 = vrot.lane.b32.xlu1 %v1844_v15, %s1752_s14 }
  0xc8   :  { %110 = vrot.lane.b32.xlu0 %v1844_v15, %s1755_s16 }
  0xcf   :  { %118 = vrot.lane.b32.xlu1 %v1844_v15, %s1751_s13 }
  0xd0   :  { %122 = vrot.lane.b32.xlu0 %v1844_v15, %s1757_s0 }
  0xd8   :  { %126 = vrot.lane.b32.xlu0 %v1844_v15, %s1754_s15 }
 0x109   :  { %v1854_v16 = vpop.permute.xlu2 %116 }
 0x111   :  { %v125_v17 = vpop.permute.xlu2 %124 }
 0x112   :  { %v1667_v32 = vpack.i.bf16 %v1844_v15, %v125_v17 }
 0x119   :  { %v1856_v18 = vpop.permute.xlu2 %102 }
 0x121   :  { %v113_v19 = vpop.permute.xlu1 %112  ;;  %v129_v20 = vpop.permute.xlu2 %128 }
 0x122   :  { %v101_v21 = vpop.permute.xlu0 %100  ;;  %1581 = vmatpush.xpose.msk.msra.mxu1 %vm130_vm1, %v129_v20 }
 0x123   :  { %155 = vrot.lane.b32.xlu2 %v101_v21, %s1758_s18 }
 0x125   :  { %1582 = vmatmul.msk.f32.vlgmr.msra.gmra.mxu1 %vm130_vm1, %v92_v14 }
 0x129   :  { %v109_v22 = vpop.permute.xlu1 %108 }
 0x12a   :  { %v105_v23 = vpop.permute.xlu0 %104  ;;  %207 = vrot.lane.b32.xlu0 %v109_v22, %s1758_s18  ;;  %v1652_v29 = vpack.i.bf16 %v109_v22, %v92_v14 }
 0x12b   :  { %233 = vrot.lane.b32.xlu2 %v113_v19, %s1758_s18  ;;  %181 = vrot.lane.b32.xlu1 %v105_v23, %s1758_s18  ;;  %v1657_v33 = vpack.i.bf16 %v105_v23, %v101_v21 }
 0x131   :  { %v107_v25 = vpop.permute.xlu1 %106 }
 0x132   :  { %v121_v24 = vpop.permute.xlu0 %120  ;;  %v1672_v35 = vpack.i.bf16 %v107_v25, %v1854_v16 }
 0x133   :  { %285 = vrot.lane.b32.xlu0 %v121_v24, %s1758_s18  ;;  %311 = vrot.lane.b32.xlu2 %v125_v17, %s1758_s18  ;;  %v1662_v34 = vpack.i.bf16 %v113_v19, %v121_v24 }
 0x134   :  { %259 = vrot.lane.b32.xlu1 %v1854_v16, %s1758_s18 }
 0x139   :  { %v1875_v27 = vpop.permute.xlu1 %114 }
 0x13a   :  { %v1868_v26 = vpop.permute.xlu0 %110 }
 0x13b   :  { %363 = vrot.lane.b32.xlu0 %v1856_v18, %s1758_s18  ;;  %389 = vrot.lane.b32.xlu2 %v107_v25, %s1758_s18 }
 0x13c   :  { %337 = vrot.lane.b32.xlu1 %v1844_v15, %s1758_s18 }
 0x141   :  { %v1887_v31 = vpop.permute.xlu1 %118 }
 0x142   :  { %v1877_v28 = vpop.permute.xlu0 %122 }
 0x143   :  { %493 = vrot.lane.b32.xlu0 %v1877_v28, %s1758_s18  ;;  %441 = vrot.lane.b32.xlu2 %v1875_v27, %s1758_s18 }
 0x144   :  { %415 = vrot.lane.b32.xlu1 %v1868_v26, %s1758_s18 }
 0x14a   :  { %v1885_v30 = vpop.permute.xlu0 %126 }
 0x14b   :  { %1653 = vrot.lane.b32.xlu0 %v1652_v29, %s1759_s19  ;;  %519 = vrot.lane.b32.xlu2 %v1885_v30, %s1758_s18 }
 0x14c   :  { %467 = vrot.lane.b32.xlu1 %v1887_v31, %s1758_s18 }
 0x153   :  { %1668 = vrot.lane.b32.xlu0 %v1667_v32, %s1759_s19  ;;  %1658 = vrot.lane.b32.xlu2 %v1657_v33, %s1759_s19 }
 0x154   :  { %1663 = vrot.lane.b32.xlu1 %v1662_v34, %s1759_s19 }
 0x15b   :  { %1673 = vrot.lane.b32.xlu0 %v1672_v35, %s1759_s19 }
 0x17d   :  { %v156_v36 = vpop.permute.xlu2 %155 }
 0x17e   :  { %1583 = vmatpush.xpose.msk.msra.mxu2 %vm130_vm1, %v156_v36 }
 0x181   :  { %1584 = vmatmul.msk.f32.vlgmr.msra.gmra.mxu2 %vm130_vm1, %v101_v21 }
 0x185   :  { %v234_v37 = vpop.permute.xlu2 %233 }
 0x186   :  { %1589 = vmatpush.xpose.msk.msrb.mxu2 %vm130_vm1, %v234_v37 }
 0x189   :  { %1590 = vmatmul.msk.f32.vlgmr.msrb.gmra.mxu2 %vm130_vm1, %v113_v19 }
 0x18d   :  { %v312_v38 = vpop.permute.xlu2 %311 }
 0x18e   :  { %1595 = vmatpush.xpose.msk.msra.mxu2 %vm130_vm1, %v312_v38 }
 0x191   :  { %1596 = vmatmul.msk.f32.vlgmr.msra.gmra.mxu2 %vm130_vm1, %v125_v17 }
 0x195   :  { %v390_v39 = vpop.permute.xlu2 %389 }
 0x196   :  { %1601 = vmatpush.xpose.msk.msrb.mxu2 %vm130_vm1, %v390_v39 }
 0x199   :  { %1602 = vmatmul.msk.f32.vlgmr.msrb.gmra.mxu2 %vm130_vm1, %v107_v25 }
 0x19c   :  { %v208_v40 = vpop.permute.xlu0 %207 }
 0x19d   :  { %v182_v41 = vpop.permute.xlu1 %181  ;;  %1587 = vmatpush.xpose.msk.msrb.mxu1 %vm130_vm1, %v208_v40  ;;  %v442_v42 = vpop.permute.xlu2 %441 }
 0x19e   :  { %1585 = vmatpush.xpose.msk.msra.mxu3 %vm130_vm1, %v182_v41 }
 0x1a0   :  { %1588 = vmatmul.msk.f32.vlgmr.msrb.gmra.mxu1 %vm130_vm1, %v109_v22 }
 0x1a1   :  { %1586 = vmatmul.msk.f32.vlgmr.msra.gmra.mxu3 %vm130_vm1, %v105_v23 }
 0x1a2   :  { %v152_v43 = vpop.f32.mrf.mxu1 }
 0x1a3   :  { %v545_v44 = vmul.f32 0.5, %v152_v43 }
 0x1a5   :  { %v286_v45 = vpop.permute.xlu0 %285  ;;  %v562_v46 = vsel %vm561_vm2, %v545_v44, -inf  ;;  %v520_v48 = vpop.permute.xlu2 %519 }
 0x1a6   :  { %v260_v47 = vpop.permute.xlu1 %259  ;;  %1593 = vmatpush.xpose.msk.msra.mxu1 %vm130_vm1, %v286_v45  ;;  %563 = vmax.xlane.f32.xlu0 %v562_v46 }
 0x1a7   :  { %1591 = vmatpush.xpose.msk.msrb.mxu3 %vm130_vm1, %v260_v47 }
 0x1a9   :  { %1594 = vmatmul.msk.f32.vlgmr.msra.gmra.mxu1 %vm130_vm1, %v121_v24 }
 0x1aa   :  { %1592 = vmatmul.msk.f32.vlgmr.msrb.gmra.mxu3 %vm130_vm1, %v1854_v16 }
 0x1ad   :  { %v364_v49 = vpop.permute.xlu0 %363  ;;  %v1659_v51 = vpop.permute.xlu2 %1658 }
 0x1ae   :  { %v338_v50 = vpop.permute.xlu1 %337  ;;  %1599 = vmatpush.xpose.msk.msrb.mxu1 %vm130_vm1, %v364_v49  ;;  %v1661_v54 = vunpack.i.h.bf16 %v1659_v51  ;;  %v1660_v55 = vunpack.i.l.bf16 %v1659_v51 }
 0x1af   :  { %1597 = vmatpush.xpose.msk.msra.mxu3 %vm130_vm1, %v338_v50 }
 0x1b1   :  { %1600 = vmatmul.msk.f32.vlgmr.msrb.gmra.mxu1 %vm130_vm1, %v1856_v18 }
 0x1b2   :  { %1605 = vmatpush.xpose.msk.msra.mxu1 %vm130_vm1, %v442_v42  ;;  %1598 = vmatmul.msk.f32.vlgmr.msra.gmra.mxu3 %vm130_vm1, %v1844_v15 }
 0x1b5   :  { %v494_v52 = vpop.permute.xlu0 %493 }
 0x1b6   :  { %1611 = vmatpush.xpose.msk.msrb.mxu1 %vm130_vm1, %v520_v48  ;;  %v416_v53 = vpop.permute.xlu1 %415 }
 0x1b7   :  { %1603 = vmatpush.xpose.msk.msrb.mxu3 %vm130_vm1, %v416_v53 }
 0x1b9   :  { %1606 = vmatmul.msk.f32.vlgmr.msra.gmra.mxu1 %vm130_vm1, %v1875_v27 }
 0x1ba   :  { %1604 = vmatmul.msk.f32.vlgmr.msrb.gmra.mxu3 %vm130_vm1, %v1868_v26  ;;  %1019 = vmatpush.msra.mxu1 %v1661_v54 }
 0x1bb   :  { %1609 = vmatpush.xpose.msk.msra.mxu3 %vm130_vm1, %v494_v52 }
 0x1bd   :  { %v1654_v56 = vpop.permute.xlu0 %1653 }
 0x1be   :  { %v1655_v57 = vunpack.i.l.bf16 %v1654_v56  ;;  %v468_v58 = vpop.permute.xlu1 %467  ;;  %v1656_v59 = vunpack.i.h.bf16 %v1654_v56 }
 0x1bf   :  { %993 = vmatpush.msrb.mxu3 %v1660_v55  ;;  %1607 = vmatpush.xpose.msk.msra.mxu2 %vm130_vm1, %v468_v58 }
 0x1c1   :  { %1612 = vmatmul.msk.f32.vlgmr.msrb.gmra.mxu1 %vm130_vm1, %v1885_v30 }
 0x1c2   :  { %1608 = vmatmul.msk.f32.vlgmr.msra.gmra.mxu2 %vm130_vm1, %v1887_v31  ;;  %1610 = vmatmul.msk.f32.vlgmr.msra.gmra.mxu3 %vm130_vm1, %v1877_v28 }
 0x1c3   :  { %967 = vmatpush.msrb.mxu2 %v1655_v57  ;;  %v1677_v57 = vpack.i.bf16 %v1868_v26, %v1875_v27 }
 0x1c5   :  { %1045 = vmatpush.msra.mxu2 %v1656_v59  ;;  %v1939_v60 = vpop.permute.xlu0 %1668 }
 0x1c6   :  { %v1941_v61 = vpop.permute.xlu1 %1663 }
 0x1c7   :  { %v1666_v62 = vunpack.i.h.bf16 %v1941_v61 }
 0x1c9   :  { %1071 = vmatpush.msra.mxu3 %v1666_v62 }
 0x1cd   :  { %v1944_v63 = vpop.permute.xlu0 %1673 }
 0x1ce   :  { %v1675_v0 = vunpack.i.l.bf16 %v1944_v63 }
 0x1d0   :  { %1097 = vmatpush.msrb.mxu1 %v1675_v0 }
 0x204   :  { %v178_v1 = vpop.f32.mrf.mxu2 }
 0x205   :  { %v1947_v2 = vmul.f32 0.5, %v178_v1 }
 0x207   :  { %v565_v3 = vsel %vm561_vm2, %v1947_v2, -inf }
 0x208   :  { %566 = vmax.xlane.f32.xlu2 %v565_v3 }
 0x20c   :  { %v256_v7 = vpop.f32.mrf.mxu2 }
 0x20d   :  { %v1955_v10 = vmul.f32 0.5, %v256_v7 }
 0x20f   :  { %v574_v17 = vsel %vm561_vm2, %v1955_v10, -inf }
 0x214   :  { %v334_v19 = vpop.f32.mrf.mxu2 }
 0x215   :  { %v1967_v21 = vmul.f32 0.5, %v334_v19 }
 0x217   :  { %v583_v32 = vsel %vm561_vm2, %v1967_v21, -inf }
 0x219   :  { %v564_v4 = vpop.xlane.xlu0 %563 }
 0x21a   :  { %v610_v8 = vsub.f32 %v545_v44, %v564_v4 }
 0x21c   :  { %v626_v11 = vmul.f32 1.442695, %v610_v8  ;;  %v412_v40 = vpop.f32.mrf.mxu2 }
 0x21d   :  { %v230_v5 = vpop.f32.mrf.mxu1  ;;  %v1989_v42 = vmul.f32 0.5, %v412_v40 }
 0x21e   :  { %v1951_v6 = vmul.f32 0.5, %v230_v5  ;;  %1687 = vpow2.f32 %v626_v11 }
 0x21f   :  { %v592_v48 = vsel %vm561_vm2, %v1989_v42, -inf }
 0x220   :  { %v571_v9 = vsel %vm561_vm2, %v1951_v6, -inf }
 0x221   :  { %572 = vmax.xlane.f32.xlu1 %v571_v9 }
 0x224   :  { %v204_v12 = vpop.f32.mrf.mxu3  ;;  %v1969_v23 = vpop.eup %1687 }
 0x225   :  { %v1957_v13 = vmul.f32 0.5, %v204_v12  ;;  %v658_v33 = vsel %vm561_vm2, %v1969_v23, 0.0 }
 0x226   :  { %v308_v14 = vpop.f32.mrf.mxu1 }
 0x227   :  { %v1959_v15 = vmul.f32 0.5, %v308_v14  ;;  %v568_v16 = vsel %vm561_vm2, %v1957_v13, -inf }
 0x228   :  { %569 = vmax.xlane.f32.xlu2 %v568_v16 }
 0x229   :  { %v580_v20 = vsel %vm561_vm2, %v1959_v15, -inf  ;;  %575 = vmax.xlane.f32.xlu1 %v574_v17 }
 0x22a   :  { %581 = vmax.xlane.f32.xlu0 %v580_v20 }
 0x22d   :  { %v282_v22 = vpop.f32.mrf.mxu3 }
 0x22e   :  { %v1971_v24 = vmul.f32 0.5, %v282_v22  ;;  %v386_v25 = vpop.f32.mrf.mxu1 }
 0x22f   :  { %v1979_v34 = vmul.f32 0.5, %v386_v25 }
 0x230   :  { %v577_v29 = vsel %vm561_vm2, %v1971_v24, -inf }
 0x231   :  { %578 = vmax.xlane.f32.xlu2 %v577_v29  ;;  %584 = vmax.xlane.f32.xlu1 %v583_v32  ;;  %v589_v38 = vsel %vm561_vm2, %v1979_v34, -inf }
 0x232   :  { %659 = vadd.xlane.f32.xlu0 %v658_v33 }
 0x235   :  { %v360_v35 = vpop.f32.mrf.mxu3 }
 0x236   :  { %v464_v36 = vpop.f32.mrf.mxu1  ;;  %v1987_v41 = vmul.f32 0.5, %v360_v35 }
 0x237   :  { %v1981_v37 = vmul.f32 0.5, %v464_v36 }
 0x238   :  { %v586_v45 = vsel %vm561_vm2, %v1987_v41, -inf }
 0x239   :  { %590 = vmax.xlane.f32.xlu2 %v589_v38  ;;  %v598_v39 = vsel %vm561_vm2, %v1981_v37, -inf }
 0x23a   :  { %599 = vmax.xlane.f32.xlu0 %v598_v39 }
 0x23d   :  { %v438_v43 = vpop.f32.mrf.mxu3 }
 0x23e   :  { %v1991_v44 = vmul.f32 0.5, %v438_v43  ;;  %v542_v47 = vpop.f32.mrf.mxu1 }
 0x23f   :  { %v1999_v49 = vmul.f32 0.5, %v542_v47 }
 0x240   :  { %v595_v46 = vsel %vm561_vm2, %v1991_v44, -inf }
 0x241   :  { %587 = vmax.xlane.f32.xlu2 %v586_v45  ;;  %596 = vmax.xlane.f32.xlu1 %v595_v46  ;;  %v607_v54 = vsel %vm561_vm2, %v1999_v49, -inf }
 0x242   :  { %593 = vmax.xlane.f32.xlu0 %v592_v48 }
 0x245   :  { %v490_v50 = vpop.f32.mrf.mxu2  ;;  %v516_v51 = vpop.f32.mrf.mxu3 }
 0x246   :  { %v2001_v52 = vmul.f32 0.5, %v490_v50  ;;  %v2003_v53 = vmul.f32 0.5, %v516_v51 }
 0x248   :  { %v601_v55 = vsel %vm561_vm2, %v2001_v52, -inf  ;;  %v604_v56 = vsel %vm561_vm2, %v2003_v53, -inf }
 0x249   :  { %608 = vmax.xlane.f32.xlu1 %v607_v54  ;;  %602 = vmax.xlane.f32.xlu2 %v601_v55 }
 0x24a   :  { %605 = vmax.xlane.f32.xlu0 %v604_v56 }
 0x25e   :  { %1678 = vrot.lane.b32.xlu0 %v1677_v57, %s1759_s19 }
 0x27b   :  { %v567_v58 = vpop.xlane.xlu2 %566 }
 0x27c   :  { %v611_v59 = vsub.f32 %v1947_v2, %v567_v58 }
 0x27e   :  { %v628_v62 = vmul.f32 1.442695, %v611_v59 }
 0x280   :  { %1689 = vpow2.f32 %v628_v62 }
 0x286   :  { %v2015_v0 = vpop.eup %1689 }
 0x287   :  { %v661_v1 = vsel %vm561_vm2, %v2015_v0, 0.0 }
 0x288   :  { %662 = vadd.xlane.f32.xlu2 %v661_v1 }
 0x294   :  { %v573_v3 = vpop.xlane.xlu1 %572 }
 0x295   :  { %v613_v4 = vsub.f32 %v1951_v6, %v573_v3 }
 0x297   :  { %v632_v5 = vmul.f32 1.442695, %v613_v4 }
 0x299   :  { %1691 = vpow2.f32 %v632_v5 }
 0x29b   :  { %v570_v7 = vpop.xlane.xlu2 %569 }
 0x29c   :  { %v612_v26 = vsub.f32 %v1957_v13, %v570_v7  ;;  %v576_v27 = vpop.xlane.xlu1 %575 }
 0x29d   :  { %v582_v8 = vpop.xlane.xlu0 %581  ;;  %v614_v2 = vsub.f32 %v1955_v10, %v576_v27 }
 0x29e   :  { %v630_v9 = vmul.f32 1.442695, %v612_v26  ;;  %v616_v11 = vsub.f32 %v1959_v15, %v582_v8  ;;  %v1665_v8 = vunpack.i.l.bf16 %v1941_v61 }
 0x29f   :  { %v2023_v12 = vpop.eup %1691  ;;  %v634_v14 = vmul.f32 1.442695, %v614_v2 }
 0x2a0   :  { %1693 = vpow2.f32 %v630_v9  ;;  %v638_v16 = vmul.f32 1.442695, %v616_v11  ;;  %v667_v6 = vsel %vm561_vm2, %v2023_v12, 0.0 }
 0x2a1   :  { %1695 = vpow2.f32 %v634_v14  ;;  %668 = vadd.xlane.f32.xlu1 %v667_v6 }
 0x2a2   :  { %1697 = vpow2.f32 %v638_v16 }
 0x2a4   :  { %v579_v17 = vpop.xlane.xlu2 %578  ;;  %v585_v20 = vpop.xlane.xlu1 %584 }
 0x2a5   :  { %v615_v13 = vsub.f32 %v1971_v24, %v579_v17  ;;  %v660_v19 = vpop.xlane.xlu0 %659  ;;  %v617_v32 = vsub.f32 %v1967_v21, %v585_v20 }
 0x2a6   :  { %v2028_v10 = vpop.eup %1693  ;;  %1699 = vrcp.f32 %v660_v19  ;;  %v715_v48 = vand.u32 2147483647, %v660_v19  ;;  %v717_v50 = vand.u32 2147483648, %v660_v19  ;;  %vm711_vm4 = vweird.f32 %v660_v19 }
 0x2a7   :  { %v2030_v15 = vpop.eup %1695  ;;  %v636_v22 = vmul.f32 1.442695, %v615_v13  ;;  %v664_v25 = vsel %vm561_vm2, %v2028_v10, 0.0  ;;  %v640_v36 = vmul.f32 1.442695, %v617_v32 }
 0x2a8   :  { %v2034_v29 = vpop.eup %1697  ;;  %665 = vadd.xlane.f32.xlu0 %v664_v25  ;;  %v670_v33 = vsel %vm561_vm2, %v2030_v15, 0.0  ;;  %vm716_vm6 = vcmp.eq.f32.partialorder %v715_v48, 8.507059e+37 }
 0x2a9   :  { %1701 = vpow2.f32 %v636_v22  ;;  %v676_v24 = vsel %vm561_vm2, %v2034_v29, 0.0  ;;  %671 = vadd.xlane.f32.xlu2 %v670_v33 }
 0x2aa   :  { %677 = vadd.xlane.f32.xlu1 %v676_v24  ;;  %1703 = vpow2.f32 %v640_v36 }
 0x2ac   :  { %v1700_v35 = vpop.eup %1699  ;;  %v591_v38 = vpop.xlane.xlu2 %590 }
 0x2ad   :  { %v707_v39 = vmul.f32 %v1700_v35, %v660_v19  ;;  %v619_v40 = vsub.f32 %v1979_v34, %v591_v38  ;;  %v600_v43 = vpop.xlane.xlu0 %599  ;;  %vm712_vm3 = vweird.f32 %v1700_v35 }
 0x2ae   :  { %v622_v45 = vsub.f32 %v1981_v37, %v600_v43  ;;  %vm713_vm5 = vmor %vm711_vm4, %vm712_vm3  ;;  %v718_v37 = vor.u32 1.1754944e-38, %v717_v50 }
 0x2af   :  { %v2043_v21 = vpop.eup %1701  ;;  %v708_v46 = vsub.f32 1.0, %v707_v39  ;;  %v644_v47 = vmul.f32 1.442695, %v619_v40  ;;  %v1682_v40 = vpack.i.bf16 %v1877_v28, %v1856_v18 }
 0x2b0   :  { %v650_v51 = vmul.f32 1.442695, %v622_v45  ;;  %v673_v55 = vsel %vm561_vm2, %v2043_v21, 0.0  ;;  %v2048_v1 = vpop.eup %1703 }
 0x2b1   :  { %v709_v54 = vmul.f32 %v1700_v35, %v708_v46  ;;  %1705 = vpow2.f32 %v644_v47 }
 0x2b2   :  { %1707 = vpow2.f32 %v650_v51  ;;  %674 = vadd.xlane.f32.xlu1 %v673_v55 }
 0x2b3   :  { %v710_v34 = vadd.f32 %v1700_v35, %v709_v54 }
 0x2b4   :  { %v588_v56 = vpop.xlane.xlu2 %587  ;;  %v597_v57 = vpop.xlane.xlu1 %596 }
 0x2b5   :  { %v714_v58 = vsel %vm713_vm5, %v1700_v35, %v710_v34  ;;  %v618_v59 = vsub.f32 %v1987_v41, %v588_v56  ;;  %v594_v62 = vpop.xlane.xlu0 %593  ;;  %v621_v41 = vsub.f32 %v1991_v44, %v597_v57 }
 0x2b6   :  { %v719_v3 = vsel %vm716_vm6, %v718_v37, %v714_v58  ;;  %v620_v4 = vsub.f32 %v1989_v42, %v594_v62 }
 0x2b7   :  { %v2051_v5 = vpop.eup %1705  ;;  %v642_v7 = vmul.f32 1.442695, %v618_v59  ;;  %v720_v26 = vmul.f32 %v1969_v23, %v719_v3  ;;  %v679_v23 = vsel %vm561_vm2, %v2048_v1, 0.0  ;;  %v648_v11 = vmul.f32 1.442695, %v621_v41 }
 0x2b8   :  { %v2054_v27 = vpop.eup %1707  ;;  %v646_v2 = vmul.f32 1.442695, %v620_v4  ;;  %v685_v9 = vsel %vm561_vm2, %v2051_v5, 0.0 }
 0x2b9   :  { %1709 = vpow2.f32 %v642_v7  ;;  %686 = vadd.xlane.f32.xlu2 %v685_v9  ;;  %1613 = vmatmul.msk.f32.vlgmr.msrb.gmra.mxu2 %vm561_vm2, %v720_v26  ;;  %v694_v42 = vsel %vm561_vm2, %v2054_v27, 0.0 }
 0x2ba   :  { %1123 = vmatpush.msrb.mxu2 %v1665_v8  ;;  %695 = vadd.xlane.f32.xlu0 %v694_v42  ;;  %1711 = vpow2.f32 %v646_v2 }
 0x2bb   :  { %680 = vadd.xlane.f32.xlu1 %v679_v23  ;;  %1713 = vpow2.f32 %v648_v11 }
 0x2bc   :  { %v609_v61 = vpop.xlane.xlu1 %608  ;;  %v603_v14 = vpop.xlane.xlu2 %602 }
 0x2bd   :  { %v625_v16 = vsub.f32 %v1999_v49, %v609_v61  ;;  %v606_v6 = vpop.xlane.xlu0 %605  ;;  %v623_v13 = vsub.f32 %v2001_v52, %v603_v14 }
 0x2be   :  { %v624_v20 = vsub.f32 %v2003_v53, %v606_v6 }
 0x2bf   :  { %v2066_v44 = vpop.eup %1709  ;;  %v656_v17 = vmul.f32 1.442695, %v625_v16  ;;  %v652_v49 = vmul.f32 1.442695, %v623_v13 }
 0x2c0   :  { %v2069_v19 = vpop.eup %1711  ;;  %v682_v25 = vsel %vm561_vm2, %v2066_v44, 0.0  ;;  %v654_v32 = vmul.f32 1.442695, %v624_v20 }
 0x2c1   :  { %1715 = vpow2.f32 %v656_v17  ;;  %v688_v22 = vsel %vm561_vm2, %v2069_v19, 0.0  ;;  %v2076_v33 = vpop.eup %1713  ;;  %v1676_v17 = vunpack.i.h.bf16 %v1944_v63 }
 0x2c2   :  { %689 = vadd.xlane.f32.xlu2 %v688_v22  ;;  %1717 = vpow2.f32 %v652_v49  ;;  %v691_v52 = vsel %vm561_vm2, %v2076_v33, 0.0 }
 0x2c3   :  { %683 = vadd.xlane.f32.xlu1 %v682_v25  ;;  %1719 = vpow2.f32 %v654_v32 }
 0x2c7   :  { %v2078_v24 = vpop.eup %1715 }
 0x2c8   :  { %v703_v53 = vsel %vm561_vm2, %v2078_v24, 0.0  ;;  %v2084_v35 = vpop.eup %1717 }
 0x2c9   :  { %v2088_v36 = vpop.eup %1719  ;;  %v697_v39 = vsel %vm561_vm2, %v2084_v35, 0.0 }
 0x2ca   :  { %704 = vadd.xlane.f32.xlu2 %v703_v53  ;;  %v700_v38 = vsel %vm561_vm2, %v2088_v36, 0.0 }
 0x2cb   :  { %692 = vadd.xlane.f32.xlu1 %v691_v52 }
 0x2ce   :  { %1336 = vrot.lane.b32.xlu0 %v1885_v30, %s1759_s19 }
 0x2d0   :  { %v2102_v34 = vpop.permute.xlu0 %1678 }
 0x2d2   :  { %698 = vadd.xlane.f32.xlu2 %v697_v39 }
 0x2d3   :  { %701 = vadd.xlane.f32.xlu1 %v700_v38 }
 0x2ea   :  { %1683 = vrot.lane.b32.xlu2 %v1682_v40, %s1759_s19 }
 0x2ec   :  { %1284 = vrot.lane.b32.xlu1 %v1887_v31, %s1759_s19  ;;  %v1670_v31 = vunpack.i.l.bf16 %v1939_v60 }
 0x2fb   :  { %v663_v43 = vpop.xlane.xlu2 %662 }
 0x2fc   :  { %1721 = vrcp.f32 %v663_v43  ;;  %v732_v47 = vand.u32 2147483648, %v663_v43  ;;  %v730_v50 = vand.u32 2147483647, %v663_v43  ;;  %vm726_vm8 = vweird.f32 %v663_v43 }
 0x2fe   :  { %v733_v54 = vor.u32 1.1754944e-38, %v732_v47  ;;  %vm731_vm10 = vcmp.eq.f32.partialorder %v730_v50, 8.507059e+37 }
 0x302   :  { %v1722_v30 = vpop.eup %1721 }
 0x303   :  { %v722_v45 = vmul.f32 %v1722_v30, %v663_v43  ;;  %vm727_vm7 = vweird.f32 %v1722_v30 }
 0x304   :  { %vm728_vm9 = vmor %vm726_vm8, %vm727_vm7 }
 0x305   :  { %v723_v46 = vsub.f32 1.0, %v722_v45 }
 0x307   :  { %v724_v48 = vmul.f32 %v1722_v30, %v723_v46 }
 0x309   :  { %v725_v51 = vadd.f32 %v1722_v30, %v724_v48 }
 0x30b   :  { %v729_v55 = vsel %vm728_vm9, %v1722_v30, %v725_v51 }
 0x30c   :  { %v734_v18 = vsel %vm731_vm10, %v733_v54, %v729_v55 }
 0x30d   :  { %v735_v28 = vmul.f32 %v2015_v0, %v734_v18 }
 0x30f   :  { %1614 = vmatmul.msk.f32.vlgmr.msrb.gmra.mxu3 %vm561_vm2, %v735_v28 }
 0x310   :  { %1149 = vmatpush.msrb.mxu3 %v1670_v31 }
 0x314   :  { %v669_v37 = vpop.xlane.xlu1 %668 }
 0x315   :  { %1723 = vrcp.f32 %v669_v37  ;;  %v762_v0 = vand.u32 2147483648, %v669_v37  ;;  %v760_v7 = vand.u32 2147483647, %v669_v37  ;;  %vm756_vm12 = vweird.f32 %v669_v37 }
 0x317   :  { %v763_v9 = vor.u32 1.1754944e-38, %v762_v0  ;;  %vm761_vm14 = vcmp.eq.f32.partialorder %v760_v7, 8.507059e+37 }
 0x31b   :  { %v1724_v56 = vpop.eup %1723  ;;  %v666_v57 = vpop.xlane.xlu0 %665 }
 0x31c   :  { %v752_v58 = vmul.f32 %v1724_v56, %v669_v37  ;;  %1725 = vrcp.f32 %v666_v57  ;;  %v672_v59 = vpop.xlane.xlu2 %671  ;;  %vm757_vm11 = vweird.f32 %v1724_v56  ;;  %vm741_vm15 = vweird.f32 %v666_v57 }
 0x31d   :  { %1727 = vrcp.f32 %v672_v59  ;;  %v2104_v62 = vpop.xlane.xlu1 %677  ;;  %vm758_vm13 = vmor %vm756_vm12, %vm757_vm11  ;;  %v745_v49 = vand.u32 2147483647, %v666_v57  ;;  %v747_v32 = vand.u32 2147483648, %v666_v57  ;;  %vm771_vm5 = vweird.f32 %v672_v59 }
 0x31e   :  { %v753_v3 = vsub.f32 1.0, %v752_v58  ;;  %1729 = vrcp.f32 %v2104_v62  ;;  %v775_v40 = vand.u32 2147483647, %v672_v59  ;;  %v777_v43 = vand.u32 2147483648, %v672_v59 }
 0x31f   :  { %vm801_vm9 = vweird.f32 %v2104_v62  ;;  %v805_v46 = vand.u32 2147483647, %v2104_v62  ;;  %v748_v54 = vor.u32 1.1754944e-38, %v747_v32  ;;  %vm746_vm11 = vcmp.eq.f32.partialorder %v745_v49, 8.507059e+37 }
 0x320   :  { %v754_v4 = vmul.f32 %v1724_v56, %v753_v3  ;;  %vm776_vm12 = vcmp.eq.f32.partialorder %v775_v40, 8.507059e+37  ;;  %v778_v31 = vor.u32 1.1754944e-38, %v777_v43 }
 0x322   :  { %v1726_v26 = vpop.eup %1725  ;;  %v755_v8 = vadd.f32 %v1724_v56, %v754_v4  ;;  %v1671_v4 = vunpack.i.h.bf16 %v1939_v60 }
 0x323   :  { %v1728_v2 = vpop.eup %1727  ;;  %v737_v41 = vmul.f32 %v1726_v26, %v666_v57  ;;  %vm742_vm3 = vweird.f32 %v1726_v26 }
 0x324   :  { %v1730_v42 = vpop.eup %1729  ;;  %v759_v23 = vsel %vm758_vm13, %v1724_v56, %v755_v8  ;;  %v767_v61 = vmul.f32 %v1728_v2, %v672_v59  ;;  %vm772_vm4 = vweird.f32 %v1728_v2  ;;  %vm2115_vm7 = vmor %vm741_vm15, %vm742_vm3  ;;  %vm806_vm13 = vcmp.eq.f32.partialorder %v805_v46, 8.507059e+37 }
 0x325   :  { %v764_v11 = vsel %vm761_vm14, %v763_v9, %v759_v23  ;;  %v738_v14 = vsub.f32 1.0, %v737_v41  ;;  %v797_v16 = vmul.f32 %v1730_v42, %v2104_v62  ;;  %v2108_v6 = vpop.xlane.xlu1 %674  ;;  %vm802_vm6 = vweird.f32 %v1730_v42  ;;  %vm2120_vm8 = vmor %vm771_vm5, %vm772_vm4 }
 0x326   :  { %v768_v13 = vsub.f32 1.0, %v767_v61  ;;  %1731 = vrcp.f32 %v2108_v6  ;;  %v765_v25 = vmul.f32 %v2023_v12, %v764_v11  ;;  %v807_v12 = vand.u32 2147483648, %v2104_v62  ;;  %vm2128_vm10 = vmor %vm801_vm9, %vm802_vm6 }
 0x327   :  { %v739_v20 = vmul.f32 %v1726_v26, %v738_v14  ;;  %v798_v22 = vsub.f32 1.0, %v797_v16  ;;  %vm786_vm15 = vweird.f32 %v2108_v6  ;;  %v792_v7 = vand.u32 2147483648, %v2108_v6 }
 0x328   :  { %v769_v52 = vmul.f32 %v1728_v2, %v768_v13  ;;  %1616 = vmatmul.msk.f32.vlgmr.msra.gmra.mxu2 %vm561_vm2, %v765_v25  ;;  %v808_v37 = vor.u32 1.1754944e-38, %v807_v12  ;;  %v1680_v61 = vunpack.i.l.bf16 %v2102_v34 }
 0x329   :  { %v740_v53 = vadd.f32 %v1726_v26, %v739_v20  ;;  %v799_v38 = vmul.f32 %v1730_v42, %v798_v22  ;;  %1227 = vmatpush.msra.mxu2 %v1676_v17 }
 0x32a   :  { %v770_v39 = vadd.f32 %v1728_v2, %v769_v52 }
 0x32b   :  { %v800_v45 = vadd.f32 %v1730_v42, %v799_v38  ;;  %v744_v48 = vsel %vm2115_vm7, %v1726_v26, %v740_v53 }
 0x32c   :  { %v1732_v47 = vpop.eup %1731  ;;  %v2132_v51 = vpop.xlane.xlu2 %686  ;;  %v774_v55 = vsel %vm2120_vm8, %v1728_v2, %v770_v39  ;;  %v749_v58 = vsel %vm746_vm11, %v748_v54, %v744_v48  ;;  %v790_v2 = vand.u32 2147483647, %v2108_v6 }
 0x32d   :  { %v804_v18 = vsel %vm2128_vm10, %v1730_v42, %v800_v45  ;;  %v782_v28 = vmul.f32 %v1732_v47, %v2108_v6  ;;  %v2139_v56 = vpop.xlane.xlu0 %695  ;;  %1733 = vrcp.f32 %v2132_v51  ;;  %v779_v62 = vsel %vm776_vm12, %v778_v31, %v774_v55 }
 0x32e   :  { %v2141_v57 = vpop.xlane.xlu1 %680  ;;  %v809_v3 = vsel %vm806_vm13, %v808_v37, %v804_v18  ;;  %vm787_vm14 = vweird.f32 %v1732_v47  ;;  %v750_v26 = vmul.f32 %v2028_v10, %v749_v58  ;;  %v780_v9 = vmul.f32 %v2030_v15, %v779_v62 }
 0x32f   :  { %v783_v59 = vsub.f32 1.0, %v782_v28  ;;  %1735 = vrcp.f32 %v2141_v57  ;;  %v810_v41 = vmul.f32 %v2034_v29, %v809_v3  ;;  %v1681_v42 = vunpack.i.h.bf16 %v2102_v34  ;;  %vm2154_vm3 = vmor %vm786_vm15, %vm787_vm14 }
 0x330   :  { %1737 = vrcp.f32 %v2139_v56  ;;  %1615 = vmatmul.msk.f32.vlgmr.msra.gmra.mxu1 %vm561_vm2, %v750_v26  ;;  %1617 = vmatmul.msk.f32.vlgmr.msra.gmra.mxu3 %vm561_vm2, %v780_v9  ;;  %v793_v29 = vor.u32 1.1754944e-38, %v792_v7  ;;  %vm791_vm4 = vcmp.eq.f32.partialorder %v790_v2, 8.507059e+37  ;;  %v822_v22 = vand.u32 2147483648, %v2141_v57 }
 0x331   :  { %v784_v0 = vmul.f32 %v1732_v47, %v783_v59  ;;  %1175 = vmatpush.msra.mxu1 %v1671_v4  ;;  %1619 = vmatmul.msk.f32.vlgmr.msrb.gmra.mxu2 %vm561_vm2, %v810_v41  ;;  %v820_v49 = vand.u32 2147483647, %v2141_v57  ;;  %v850_v38 = vand.u32 2147483647, %v2132_v51  ;;  %vm816_vm6 = vweird.f32 %v2141_v57 }
 0x332   :  { %1253 = vmatpush.msra.mxu3 %v1681_v42  ;;  %1279 = vmatpush.msrb.mxu2 %v1680_v61  ;;  %v852_v39 = vand.u32 2147483648, %v2132_v51  ;;  %v823_v43 = vor.u32 1.1754944e-38, %v822_v22  ;;  %vm846_vm8 = vweird.f32 %v2132_v51  ;;  %v895_v46 = vand.u32 2147483647, %v2139_v56 }
 0x333   :  { %v785_v8 = vadd.f32 %v1732_v47, %v784_v0  ;;  %v2159_v60 = vpop.eup %1733  ;;  %vm821_vm9 = vcmp.eq.f32.partialorder %v820_v49, 8.507059e+37  ;;  %vm891_vm10 = vweird.f32 %v2139_v56  ;;  %v897_v48 = vand.u32 2147483648, %v2139_v56 }
 0x334   :  { %v842_v17 = vmul.f32 %v2159_v60, %v2132_v51  ;;  %vm847_vm11 = vweird.f32 %v2159_v60 }
 0x335   :  { %v789_v10 = vsel %vm2154_vm3, %v1732_v47, %v785_v8  ;;  %v1736_v15 = vpop.eup %1735  ;;  %v2166_v11 = vpop.xlane.xlu2 %689 }
 0x336   :  { %v2168_v14 = vpop.xlane.xlu1 %683  ;;  %v2170_v16 = vpop.eup %1737  ;;  %v812_v34 = vmul.f32 %v1736_v15, %v2141_v57  ;;  %1739 = vrcp.f32 %v2166_v11  ;;  %v794_v6 = vsel %vm791_vm4, %v793_v29, %v789_v10  ;;  %vm817_vm5 = vweird.f32 %v1736_v15 }
 0x337   :  { %1741 = vrcp.f32 %v2168_v14  ;;  %v887_v20 = vmul.f32 %v2170_v16, %v2139_v56  ;;  %v795_v32 = vmul.f32 %v2043_v21, %v794_v6  ;;  %v843_v53 = vsub.f32 1.0, %v842_v17  ;;  %vm818_vm7 = vmor %vm816_vm6, %vm817_vm5 }
 0x338   :  { %v813_v13 = vsub.f32 1.0, %v812_v34  ;;  %v867_v28 = vand.u32 2147483648, %v2166_v11  ;;  %v865_v58 = vand.u32 2147483647, %v2166_v11  ;;  %v835_v59 = vand.u32 2147483647, %v2168_v14 }
 0x339   :  { %1618 = vmatmul.msk.f32.vlgmr.msrb.gmra.mxu1 %vm561_vm2, %v795_v32  ;;  %v888_v40 = vsub.f32 1.0, %v887_v20  ;;  %v844_v18 = vmul.f32 %v2159_v60, %v843_v53  ;;  %v837_v62 = vand.u32 2147483648, %v2168_v14  ;;  %vm861_vm13 = vweird.f32 %v2166_v11 }
 0x33a   :  { %v814_v25 = vmul.f32 %v1736_v15, %v813_v13  ;;  %vm892_vm15 = vweird.f32 %v2170_v16  ;;  %v868_v9 = vor.u32 1.1754944e-38, %v867_v28  ;;  %vm831_vm4 = vweird.f32 %v2168_v14 }
 0x33b   :  { %v889_v31 = vmul.f32 %v2170_v16, %v888_v40  ;;  %v845_v8 = vadd.f32 %v2159_v60, %v844_v18  ;;  %vm866_vm5 = vcmp.eq.f32.partialorder %v865_v58, 8.507059e+37  ;;  %v838_v29 = vor.u32 1.1754944e-38, %v837_v62 }
 0x33c   :  { %v2182_v52 = vpop.eup %1739  ;;  %v815_v63 = vadd.f32 %v1736_v15, %v814_v25  ;;  %v853_v20 = vor.u32 1.1754944e-38, %v852_v39  ;;  %v898_v53 = vor.u32 1.1754944e-38, %v897_v48 }
 0x33d   :  { %v857_v12 = vmul.f32 %v2182_v52, %v2166_v11  ;;  %v2190_v30 = vpop.xlane.xlu2 %704  ;;  %v1742_v45 = vpop.eup %1741  ;;  %vm862_vm12 = vweird.f32 %v2182_v52 }
 0x33e   :  { %v2192_v21 = vpop.xlane.xlu1 %692  ;;  %v819_v47 = vsel %vm818_vm7, %v1736_v15, %v815_v63  ;;  %1743 = vrcp.f32 %v2190_v30  ;;  %v827_v55 = vmul.f32 %v1742_v45, %v2168_v14  ;;  %vm832_vm14 = vweird.f32 %v1742_v45  ;;  %vm2217_vm3 = vmor %vm861_vm13, %vm862_vm12 }
 0x33f   :  { %v824_v50 = vsel %vm821_vm9, %v823_v43, %v819_v47  ;;  %v858_v54 = vsub.f32 1.0, %v857_v12  ;;  %1745 = vrcp.f32 %v2192_v21  ;;  %vm833_vm6 = vmor %vm831_vm4, %vm832_vm14  ;;  %vm836_vm7 = vcmp.eq.f32.partialorder %v835_v59, 8.507059e+37 }
 0x340   :  { %v828_v57 = vsub.f32 1.0, %v827_v55  ;;  %v1337_v3 = vpop.permute.xlu0 %1336  ;;  %v825_v0 = vmul.f32 %v2048_v1, %v824_v50  ;;  %v890_v1 = vadd.f32 %v2170_v16, %v889_v31  ;;  %vm2239_vm9 = vmor %vm846_vm8, %vm847_vm11  ;;  %vm2246_vm12 = vcmp.eq.f32.partialorder %v850_v38, 8.507059e+37 }
 0x341   :  { %v859_v37 = vmul.f32 %v2182_v52, %v858_v54  ;;  %vm2254_vm8 = vmor %vm891_vm10, %vm892_vm15  ;;  %v849_v51 = vsel %vm2239_vm9, %v2159_v60, %v845_v8  ;;  %v882_v38 = vand.u32 2147483648, %v2192_v21  ;;  %vm896_vm10 = vcmp.eq.f32.partialorder %v895_v46, 8.507059e+37 }
 0x342   :  { %v829_v7 = vmul.f32 %v1742_v45, %v828_v57  ;;  %1620 = vmatmul.msk.f32.vlgmr.msrb.gmra.mxu3 %vm561_vm2, %v825_v0  ;;  %v894_v49 = vsel %vm2254_vm8, %v2170_v16, %v890_v1  ;;  %v854_v16 = vsel %vm2246_vm12, %v853_v20, %v849_v51  ;;  %vm876_vm13 = vweird.f32 %v2192_v21 }
 0x343   :  { %v860_v4 = vadd.f32 %v2182_v52, %v859_v37  ;;  %1357 = vmatpush.msrb.mxu3 %v1337_v3  ;;  %v899_v12 = vsel %vm896_vm10, %v898_v53, %v894_v49  ;;  %v883_v47 = vor.u32 1.1754944e-38, %v882_v38  ;;  %vm936_vm4 = vweird.f32 %v2190_v30 }
 0x344   :  { %v2213_v26 = vpop.eup %1743  ;;  %v830_v42 = vadd.f32 %v1742_v45, %v829_v7  ;;  %v940_v28 = vand.u32 2147483647, %v2190_v30  ;;  %v942_v31 = vand.u32 2147483648, %v2190_v30  ;;  %v855_v59 = vmul.f32 %v2051_v5, %v854_v16 }
 0x345   :  { %v864_v41 = vsel %vm2217_vm3, %v2182_v52, %v860_v4  ;;  %v932_v23 = vmul.f32 %v2213_v26, %v2190_v30  ;;  %v2229_v61 = vpop.xlane.xlu2 %698  ;;  %v1746_v15 = vpop.eup %1745  ;;  %v880_v52 = vand.u32 2147483647, %v2192_v21  ;;  %vm937_vm15 = vweird.f32 %v2213_v26 }
 0x346   :  { %v2231_v10 = vpop.xlane.xlu1 %701  ;;  %1747 = vrcp.f32 %v2229_v61  ;;  %v869_v14 = vsel %vm866_vm5, %v868_v9, %v864_v41  ;;  %v834_v34 = vsel %vm833_vm6, %v1742_v45, %v830_v42  ;;  %v872_v17 = vmul.f32 %v1746_v15, %v2192_v21  ;;  %vm2298_vm5 = vmor %vm936_vm4, %vm937_vm15 }
 0x347   :  { %v933_v6 = vsub.f32 1.0, %v932_v23  ;;  %v839_v25 = vsel %vm836_vm7, %v838_v29, %v834_v34  ;;  %1749 = vrcp.f32 %v2231_v10  ;;  %v870_v39 = vmul.f32 %v2069_v19, %v869_v14 }
 0x348   :  { %v873_v32 = vsub.f32 1.0, %v872_v17  ;;  %v840_v63 = vmul.f32 %v2066_v44, %v839_v25  ;;  %vm877_vm11 = vweird.f32 %v1746_v15  ;;  %vm2279_vm14 = vcmp.eq.f32.partialorder %v880_v52, 8.507059e+37 }
 0x349   :  { %v934_v40 = vmul.f32 %v2213_v26, %v933_v6  ;;  %1623 = vmatmul.msk.f32.vlgmr.msra.gmra.mxu2 %vm561_vm2, %v870_v39  ;;  %vm878_vm3 = vmor %vm876_vm13, %vm877_vm11  ;;  %v925_v30 = vand.u32 2147483647, %v2231_v10  ;;  %v927_v0 = vand.u32 2147483648, %v2231_v10  ;;  %v900_v4 = vmul.f32 %v2054_v27, %v899_v12  ;;  %v969_v6 = vpop.f32.mrf.mxu2  ;;  %v31_v39 = vld [vmem:[%s2392_s2 + $0x18] sm:$0xff] }
 0x34a   :  { %v874_v60 = vmul.f32 %v1746_v15, %v873_v32  ;;  %1621 = vmatmul.msk.f32.vlgmr.msra.gmra.mxu1 %vm561_vm2, %v840_v63  ;;  %v943_v8 = vor.u32 1.1754944e-38, %v942_v31  ;;  %vm906_vm9 = vweird.f32 %v2229_v61  ;;  %v912_v2 = vand.u32 2147483648, %v2229_v61  ;;  %1629 = vmatpush.xpose.msk.msrb.mxu0 %vm32_vm0, %v31_v39 }
 0x34b   :  { %v935_v54 = vadd.f32 %v2213_v26, %v934_v40  ;;  %vm941_vm12 = vcmp.eq.f32.partialorder %v940_v28, 8.507059e+37  ;;  %vm921_vm10 = vweird.f32 %v2231_v10  ;;  %v928_v41 = vor.u32 1.1754944e-38, %v927_v0  ;;  %v30_v40 = vld [vmem:[%s2392_s2 + $0x10] sm:$0xff] }
 0x34c   :  { %v2272_v43 = vpop.eup %1747  ;;  %v875_v44 = vadd.f32 %v1746_v15, %v874_v60  ;;  %vm926_vm13 = vcmp.eq.f32.partialorder %v925_v30, 8.507059e+37  ;;  %v29_v60 = vld [vmem:[%s2392_s2 + $0x8] sm:$0xff]  ;;  %vm1422_vm15 = vcmask 97280   ;;  %vm1428_vm4 = vcmask 162816  }
 0x34d   :  { %v902_v56 = vmul.f32 %v2272_v43, %v2229_v61  ;;  %v1684_v45 = vpop.permute.xlu2 %1683  ;;  %v1750_v46 = vpop.eup %1749  ;;  %vm907_vm6 = vweird.f32 %v2272_v43  ;;  %v939_v5 = vsel %vm2298_vm5, %v2213_v26, %v935_v54  ;;  %v910_v26 = vand.u32 2147483647, %v2229_v61 }
 0x34e   :  { %v1686_v48 = vunpack.i.h.bf16 %v1684_v45  ;;  %v1685_v50 = vunpack.i.l.bf16 %v1684_v45  ;;  %v879_v55 = vsel %vm878_vm3, %v1746_v15, %v875_v44  ;;  %v917_v21 = vmul.f32 %v1750_v46, %v2231_v10  ;;  %vm2317_vm8 = vmor %vm906_vm9, %vm907_vm6  ;;  %1630 = vmatpush.xpose.msk.msrb.mxu0 %vm32_vm0, %v30_v40 }
 0x34f   :  { %v903_v18 = vsub.f32 1.0, %v902_v56  ;;  %v884_v37 = vsel %vm2279_vm14, %v883_v47, %v879_v55  ;;  %vm922_vm7 = vweird.f32 %v1750_v46  ;;  %v944_v1 = vsel %vm941_vm12, %v943_v8, %v939_v5 }
 0x350   :  { %1201 = vmatpush.msrb.mxu1 %v1685_v50  ;;  %1331 = vmatpush.msra.mxu2 %v1686_v48  ;;  %v918_v58 = vsub.f32 1.0, %v917_v21  ;;  %v885_v62 = vmul.f32 %v2076_v33, %v884_v37  ;;  %vm923_vm11 = vmor %vm921_vm10, %vm922_vm7  ;;  %v913_v15 = vor.u32 1.1754944e-38, %v912_v2  ;;  %vm911_vm14 = vcmp.eq.f32.partialorder %v910_v26, 8.507059e+37 }
 0x351   :  { %v904_v57 = vmul.f32 %v2272_v43, %v903_v18  ;;  %1625 = vmatmul.msk.f32.vlgmr.msrb.gmra.mxu2 %vm561_vm2, %v900_v4  ;;  %v945_v14 = vmul.f32 %v2078_v24, %v944_v1  ;;  %vm1425_vm3 = vcmask 130048   ;;  %vm1431_vm5 = vcmask 195584  }
 0x352   :  { %v919_v7 = vmul.f32 %v1750_v46, %v918_v58  ;;  %1624 = vmatmul.msk.f32.vlgmr.msra.gmra.mxu3 %vm561_vm2, %v885_v62  ;;  %1622 = vmatmul.msk.f32.vlgmr.msrb.gmra.mxu1 %vm561_vm2, %v855_v59  ;;  %vm1434_vm6 = vcmask 228352   ;;  %vm1552_vm7 = vcmask 1040384  }
 0x353   :  { %v905_v33 = vadd.f32 %v2272_v43, %v904_v57  ;;  %1631 = vmatpush.xpose.msk.msrb.mxu0 %vm32_vm0, %v29_v60 }
 0x354   :  { %v920_v9 = vadd.f32 %v1750_v46, %v919_v7 }
 0x355   :  { %v909_v42 = vsel %vm2317_vm8, %v2272_v43, %v905_v33  ;;  %v28_v43 = vld [vmem:[%s2392_s2] sm:$0xff]  ;;  %s1767_s2 = smov 32  }
 0x356   :  { %v924_v23 = vsel %vm923_vm11, %v1750_v46, %v920_v9  ;;  %v914_v61 = vsel %vm911_vm14, %v913_v15, %v909_v42 }
 0x357   :  { %v929_v29 = vsel %vm926_vm13, %v928_v41, %v924_v23  ;;  %v915_v34 = vmul.f32 %v2084_v35, %v914_v61  ;;  %1632 = vmatpush.xpose.msk.msrb.mxu0 %vm32_vm0, %v28_v43 }
 0x358   :  { %v930_v11 = vmul.f32 %v2088_v36, %v929_v29 }
 0x35a   :  { %1628 = vmatmul.msk.f32.vlgmr.msrb.gmra.mxu3 %vm561_vm2, %v945_v14  ;;  %1627 = vmatmul.msk.f32.vlgmr.msra.gmra.mxu2 %vm561_vm2, %v930_v11 }
 0x35e   :  { %v1285_v10 = vpop.permute.xlu1 %1284 }
 0x35f   :  { %1305 = vmatpush.msra.mxu1 %v1285_v10 }
 0x360   :  { %1626 = vmatmul.msk.f32.vlgmr.msra.gmra.mxu1 %vm561_vm2, %v915_v34 }
 0x392   :  { %v995_v36 = vpop.f32.mrf.mxu3 }
 0x3ab   :  { %v1047_v17 = vpop.f32.mrf.mxu2 }
 0x3ac   :  { %1380 = vrot.lane.b32.xlu2 %v1047_v17, %s1760_s20 }
 0x3ad   :  { %v1021_v13 = vpop.f32.mrf.mxu1 }
 0x3ae   :  { %1372 = vrot.lane.b32.xlu0 %v1021_v13, %s1761_s21 }
 0x3b3   :  { %v1073_v35 = vpop.f32.mrf.mxu3 }
 0x3b4   :  { %v1125_v24 = vpop.f32.mrf.mxu2 }
 0x3b5   :  { %1404 = vrot.lane.b32.xlu2 %v1125_v24, %s1763_s23 }
 0x3b6   :  { %1364 = vrot.lane.b32.xlu0 %v995_v36, %s1762_s22  ;;  %v1099_v20 = vpop.f32.mrf.mxu1 }
 0x3b7   :  { %1396 = vrot.lane.b32.xlu1 %v1099_v20, %s1764_s24 }
 0x3be   :  { %1388 = vrot.lane.b32.xlu0 %v1073_v35, %s1765_s25 }
 0x3c5   :  { %v1151_v22 = vpop.f32.mrf.mxu3 }
 0x3c6   :  { %1412 = vrot.lane.b32.xlu0 %v1151_v22, %s1766_s26 }
 0x3c7   :  { %v1177_v25 = vpop.f32.mrf.mxu1 }
 0x3cc   :  { %v1229_v51 = vpop.f32.mrf.mxu2 }
 0x3cd   :  { %1374 = vrot.lane.b32.xlu2 %v1229_v51, %s1761_s21 }
 0x3cf   :  { %v1203_v49 = vpop.f32.mrf.mxu1 }
 0x3d0   :  { %1366 = vrot.lane.b32.xlu1 %v1203_v49, %s1762_s22 }
 0x3d4   :  { %v1281_v52 = vpop.f32.mrf.mxu2 }
 0x3d5   :  { %v1255_v32 = vpop.f32.mrf.mxu3 }
 0x3d6   :  { %1382 = vrot.lane.b32.xlu0 %v1255_v32, %s1760_s20 }
 0x3d8   :  { %1390 = vrot.lane.b32.xlu1 %v1281_v52, %s1765_s25 }
 0x3dd   :  { %v1307_v53 = vpop.f32.mrf.mxu1  ;;  %v1333_v38 = vpop.f32.mrf.mxu2 }
 0x3de   :  { %1398 = vrot.lane.b32.xlu2 %v1307_v53, %s1764_s24  ;;  %1406 = vrot.lane.b32.xlu0 %v1333_v38, %s1763_s23  ;;  %v1359_v63 = vpop.f32.mrf.mxu3 }
 0x3e0   :  { %1414 = vrot.lane.b32.xlu1 %v1359_v63, %s1766_s26 }
 0x406   :  { %v1381_v19 = vpop.permute.xlu2 %1380 }
 0x40f   :  { %v1405_v54 = vpop.permute.xlu2 %1404 }
 0x420   :  { %v1373_v16 = vpop.permute.xlu0 %1372 }
 0x427   :  { %v1375_v37 = vpop.permute.xlu2 %1374 }
 0x428   :  { %v1365_v12 = vpop.permute.xlu0 %1364 }
 0x429   :  { %v1418_v44 = vsel %vm130_vm1, %v969_v6, %v1365_v12  ;;  %v1397_v48 = vpop.permute.xlu1 %1396 }
 0x42a   :  { %v1420_v56 = vsel %vm561_vm2, %v1418_v44, %v1373_v16 }
 0x42b   :  { %v1423_v46 = vsel %vm1422_vm15, %v1420_v56, %v1381_v19 }
 0x430   :  { %v1389_v45 = vpop.permute.xlu0 %1388 }
 0x431   :  { %v1426_v47 = vsel %vm1425_vm3, %v1423_v46, %v1389_v45 }
 0x432   :  { %v1429_v50 = vsel %vm1428_vm4, %v1426_v47, %v1397_v48 }
 0x433   :  { %v1432_v18 = vsel %vm1431_vm5, %v1429_v50, %v1405_v54 }
 0x438   :  { %v1413_v55 = vpop.permute.xlu0 %1412  ;;  %v1399_v30 = vpop.permute.xlu2 %1398 }
 0x439   :  { %v1435_v21 = vsel %vm1434_vm6, %v1432_v18, %v1413_v55 }
 0x43a   :  { %1633 = vmatmul.msk.f32.vlgmr.msrb.gmra.mxu0 %vm32_vm0, %v1435_v21 }
 0x442   :  { %v1367_v28 = vpop.permute.xlu1 %1366 }
 0x443   :  { %v1419_v31 = vsel %vm130_vm1, %v1177_v25, %v1367_v28  ;;  %v1557_v25 = vlaneseq  ;;  %vm1534_vm1 = vcmask 523264  }
 0x444   :  { %v1421_v58 = vsel %vm561_vm2, %v1419_v31, %v1375_v37  ;;  %vm1537_vm2 = vcmask 785408  }
 0x445   :  { %vm1559_vm9 = vcmp.lt.s32.totalorder %v1557_v25, 256 }
 0x448   :  { %v1383_v57 = vpop.permute.xlu0 %1382 }
 0x449   :  { %v1424_v59 = vsel %vm1422_vm15, %v1421_v58, %v1383_v57 }
 0x44a   :  { %v1391_v62 = vpop.permute.xlu1 %1390 }
 0x44b   :  { %v1427_v3 = vsel %vm1425_vm3, %v1424_v59, %v1391_v62 }
 0x44c   :  { %v1430_v0 = vsel %vm1428_vm4, %v1427_v3, %v1399_v30 }
 0x450   :  { %v1407_v4 = vpop.permute.xlu0 %1406 }
 0x451   :  { %v1433_v5 = vsel %vm1431_vm5, %v1430_v0, %v1407_v4 }
 0x452   :  { %v1415_v33 = vpop.permute.xlu1 %1414 }
 0x453   :  { %v1436_v7 = vsel %vm1434_vm6, %v1433_v5, %v1415_v33 }
 0x454   :  { %1634 = vmatmul.msk.f32.gmra.mxu0 %vm32_vm0, %v1436_v7 }
 0x4b7   :  { %v1472_v8 = vpop.f32.mrf.mxu0 }
 0x4b8   :  { %v1508_v2 = vrot.slane %v1472_v8, 5  ;;  %v1516_v27 = vrot.slane %v1472_v8, 6  ;;  %v1480_v26 = vrot.slane %v1472_v8, 1  ;;  %v1524_v9 = vrot.slane %v1472_v8, 7 }
 0x4b9   :  { %v1488_v1 = vrot.slane %v1472_v8, 2  ;;  %v1496_v61 = vrot.slane %v1472_v8, 3  ;;  %v1504_v51 = vrot.slane %v1472_v8, 4 }
 0x4ba   :  { %1510 = vrot.lane.b32.xlu2 %v1508_v2, %s1767_s2  ;;  %1518 = vrot.lane.b32.xlu1 %v1516_v27, %s1759_s19 }
 0x4bb   :  { %1482 = vrot.lane.b32.xlu0 %v1480_v26, %s1767_s2 }
 0x4c2   :  { %1526 = vrot.lane.b32.xlu2 %v1524_v9, %s1758_s18  ;;  %1490 = vrot.lane.b32.xlu1 %v1488_v1, %s1759_s19 }
 0x4d1   :  { %v1475_v41 = vpop.f32.mrf.mxu0 }
 0x4d2   :  { %v1517_v42 = vrot.slane %v1475_v41, 6  ;;  %v1509_v23 = vrot.slane %v1475_v41, 5  ;;  %v1481_v15 = vrot.slane %v1475_v41, 1  ;;  %v1525_v29 = vrot.slane %v1475_v41, 7 }
 0x4d3   :  { %v1489_v11 = vrot.slane %v1475_v41, 2  ;;  %v1497_v14 = vrot.slane %v1475_v41, 3  ;;  %v1505_v35 = vrot.slane %v1475_v41, 4 }
 0x4d4   :  { %1520 = vrot.lane.b32.xlu2 %v1517_v42, %s1759_s19  ;;  %1512 = vrot.lane.b32.xlu0 %v1509_v23, %s1767_s2 }
 0x4d5   :  { %1484 = vrot.lane.b32.xlu1 %v1481_v15, %s1767_s2 }
 0x4dc   :  { %1528 = vrot.lane.b32.xlu0 %v1525_v29, %s1758_s18  ;;  %1492 = vrot.lane.b32.xlu2 %v1489_v11, %s1759_s19 }
 0x4dd   :  { %1500 = vrot.lane.b32.xlu1 %v1497_v14, %s1758_s18 }
 0x4e4   :  { %1498 = vrot.lane.b32.xlu0 %v1496_v61, %s1758_s18 }
 0x514   :  { %v1511_v10 = vpop.permute.xlu2 %1510 }
 0x515   :  { %v1540_v53 = vsel %vm32_vm0, %v1504_v51, %v1511_v10 }
 0x51c   :  { %v1527_v6 = vpop.permute.xlu2 %1526 }
 0x52c   :  { %v1519_v34 = vpop.permute.xlu1 %1518 }
 0x52d   :  { %v1483_v17 = vpop.permute.xlu0 %1482  ;;  %v1542_v40 = vsel %vm1534_vm1, %v1540_v53, %v1519_v34 }
 0x52e   :  { %v1521_v36 = vpop.permute.xlu2 %1520  ;;  %v1544_v44 = vsel %vm1537_vm2, %v1542_v40, %v1527_v6  ;;  %v1532_v19 = vsel %vm32_vm0, %v1472_v8, %v1483_v17 }
 0x52f   :  { %v1550_v56 = vrot.slane %v1544_v44, 7 }
 0x534   :  { %v1491_v13 = vpop.permute.xlu1 %1490 }
 0x535   :  { %v1535_v45 = vsel %vm1534_vm1, %v1532_v19, %v1491_v13 }
 0x536   :  { %v1493_v38 = vpop.permute.xlu2 %1492 }
 0x546   :  { %v1513_v24 = vpop.permute.xlu0 %1512 }
 0x547   :  { %v1485_v20 = vpop.permute.xlu1 %1484  ;;  %v1541_v22 = vsel %vm32_vm0, %v1505_v35, %v1513_v24 }
 0x548   :  { %v1533_v49 = vsel %vm32_vm0, %v1475_v41, %v1485_v20  ;;  %v1543_v32 = vsel %vm1534_vm1, %v1541_v22, %v1521_v36 }
 0x549   :  { %v1536_v60 = vsel %vm1534_vm1, %v1533_v49, %v1493_v38 }
 0x54e   :  { %v1529_v52 = vpop.permute.xlu0 %1528 }
 0x54f   :  { %v1501_v63 = vpop.permute.xlu1 %1500  ;;  %v1545_v39 = vsel %vm1537_vm2, %v1543_v32, %v1529_v52 }
 0x550   :  { %v1551_v43 = vrot.slane %v1545_v39, 7  ;;  %v1539_v16 = vsel %vm1537_vm2, %v1536_v60, %v1501_v63 }
 0x552   :  { %v1554_v12 = vsel %vm1552_vm7, %v1539_v16, %v1551_v43 }
 0x553   :  { %1562 = vst.msk [vmem:[%s2393_s3 + $0x2] sm:$0x3] %vm1559_vm9, %v1554_v12 }
 0x556   :  { %v1499_v46 = vpop.permute.xlu0 %1498 }
 0x557   :  { %v1538_v47 = vsel %vm1537_vm2, %v1535_v45, %v1499_v46 }
 0x558   :  { %v1553_v48 = vsel %vm1552_vm7, %v1538_v47, %v1550_v56 }
 0x559   :  { %1561 = vst.msk [vmem:[%s2393_s3] sm:$0x3] %vm1559_vm9, %v1553_v48 }

</bundles_post_ra>
